<compile_context>
chip_gen: v7x
topology: tpu7x:2x2x1
jax: 0.10.0
libtpu: 0.0.40
codegen_flags: <defaults>
</compile_context>

<pallas_src>
import jax
import jax.numpy as jnp
from jax import lax
from jax.experimental import pallas as pl
from jax.experimental.pallas import tpu as pltpu


# ----------------------------------------------------------------------------
# Pallas kernel: IPA attention core (all heads per invocation, flash-style)
# ----------------------------------------------------------------------------
def _ipa_attention_kernel(wb_ref, qc_ref, kc_ref, kb_ref, vc_ref, pair_ref,
                          out_pair_ref, out_vc_ref,
                          m_sc, l_sc, accp_sc, accv_sc):
    j = pl.program_id(1)

    @pl.when(j == 0)
    def _init():
        m_sc[...] = jnp.full_like(m_sc, -jnp.inf)
        l_sc[...] = jnp.zeros_like(l_sc)
        accp_sc[...] = jnp.zeros_like(accp_sc)
        accv_sc[...] = jnp.zeros_like(accv_sc)

    qc = qc_ref[...]        # (H, TQ, Dc)  bf16  [c1*q | 2*c2*qp_centered]
    kc = kc_ref[...]        # (H, TK, Dc)  bf16  [k    | kp_centered]
    vc = vc_ref[...]        # (H, TK, Dv)  bf16  [v    | vp_global]
    kb = kb_ref[...]        # (H, TK)      f32   -c2*|kp_centered|^2
    wb = wb_ref[...]        # (H, Z)       f32   w_L * W_b^T
    pair = pair_ref[...]    # (TQ, Z, TK)  f32   pair_rep transposed (lane-dense)

    tq = qc.shape[1]
    n_heads, n_z = wb.shape

    # (1) dot-product + point cross-term logits: one batched bf16 MXU matmul.
    s = lax.dot_general(qc, kc, (((2,), (2,)), ((0,), (0,))),
                        preferred_element_type=jnp.float32)            # (H,TQ,TK)

    # (2) pair bias computed from the resident pair tile (drops the (H, N, N)
    #     HBM bias stream).  Batched over query rows, then a major-dim
    #     (XLU-side) transpose into the (H, TQ, TK) logit layout.
    wbq = jnp.broadcast_to(wb[None], (tq, n_heads, n_z))               # (TQ,H,Z)
    bias_qhk = lax.dot_general(wbq, pair, (((2,), (1,)), ((0,), (0,))),
                               preferred_element_type=jnp.float32)     # (TQ,H,TK)
    s = s + jnp.transpose(bias_qhk, (1, 0, 2)) + kb[:, None, :]

    # (3) online softmax over the key (j) axis.
    m_prev = m_sc[...]                                                 # (H,TQ,1)
    m_new = jnp.maximum(m_prev, jnp.max(s, axis=-1, keepdims=True))
    alpha = jnp.exp(m_prev - m_new)
    p = jnp.exp(s - m_new)                                             # (H,TQ,TK)

    m_sc[...] = m_new
    l_sc[...] = alpha * l_sc[...] + jnp.sum(p, axis=-1, keepdims=True)

    # (4) fused value/point accumulation: p @ [v | vp] (bf16 MXU, f32 acc).
    accv_sc[...] = alpha * accv_sc[...] + lax.dot_general(
        p.astype(jnp.bfloat16), vc, (((2,), (1,)), ((0,), (0,))),
        preferred_element_type=jnp.float32)                            # (H,TQ,Dv)

    # (5) pair-weighted accumulation: ONE dot_general batched over query rows
    #     (no per-head M=1 matmuls).
    p_t = jnp.transpose(p, (1, 0, 2))                                  # (TQ,H,TK)
    alpha_t = jnp.transpose(alpha, (1, 0, 2))                          # (TQ,H,1)
    accp_sc[...] = alpha_t * accp_sc[...] + lax.dot_general(
        p_t, pair, (((2,), (2,)), ((0,), (0,))),
        preferred_element_type=jnp.float32)                            # (TQ,H,Z)

    @pl.when(j == pl.num_programs(1) - 1)
    def _finalize():
        inv_l = 1.0 / l_sc[...]          # exact; finalize runs once per i-block
        out_vc_ref[...] = (accv_sc[...] * inv_l).astype(out_vc_ref.dtype)
        inv_l_t = jnp.transpose(inv_l, (1, 0, 2))                      # (TQ,H,1)
        out_pair_ref[...] = (accp_sc[...] * inv_l_t).astype(out_pair_ref.dtype)


def ipa_attention_pallas(wb, qc, kc, kb, vc, pair_t, *,
                         block_q=256, block_k=256,
                         vmem_limit_bytes=32 * 1024 * 1024):
    # block_q/block_k: 256/256 fills the 256-wide MXU on v6e/v7x (keep
    # N//block_q >= 2 on v7x so both TensorCores stay busy); use 128/128 on v5e.
    H, N, Dc = qc.shape
    Dv = vc.shape[-1]
    Z = pair_t.shape[1]
    tq = min(block_q, N)
    tk = min(block_k, N)
    if N % tq != 0 or N % tk != 0:
        raise ValueError("sequence length must be divisible by the block sizes")
    grid = (N // tq, N // tk)

    return pl.pallas_call(
        _ipa_attention_kernel,
        out_shape=(
            jax.ShapeDtypeStruct((N, H, Z), jnp.float32),    # pair-weighted mean
            jax.ShapeDtypeStruct((H, N, Dv), jnp.float32),   # [value | points]
        ),
        grid=grid,
        in_specs=[
            pl.BlockSpec((H, Z), lambda i, j: (0, 0)),           # w_L * W_b^T
            pl.BlockSpec((H, tq, Dc), lambda i, j: (0, i, 0)),   # fused q operand
            pl.BlockSpec((H, tk, Dc), lambda i, j: (0, j, 0)),   # fused k operand
            pl.BlockSpec((H, tk), lambda i, j: (0, j)),          # -c2*|kp|^2 (f32)
            pl.BlockSpec((H, tk, Dv), lambda i, j: (0, j, 0)),   # fused [v|vp]
            pl.BlockSpec((tq, Z, tk), lambda i, j: (i, 0, j)),   # pair tile (lane-dense)
        ],
        out_specs=(
            pl.BlockSpec((tq, H, Z), lambda i, j: (i, 0, 0)),
            pl.BlockSpec((H, tq, Dv), lambda i, j: (0, i, 0)),
        ),
        scratch_shapes=[
            pltpu.VMEM((H, tq, 1), jnp.float32),    # running max
            pltpu.VMEM((H, tq, 1), jnp.float32),    # running denominator
            pltpu.VMEM((tq, H, Z), jnp.float32),    # pair accumulator
            pltpu.VMEM((H, tq, Dv), jnp.float32),   # value/points accumulator
        ],
        compiler_params=pltpu.CompilerParams(
            dimension_semantics=("parallel", "arbitrary"),
            vmem_limit_bytes=vmem_limit_bytes),
    )(wb, qc, kc, kb, vc, pair_t)


# ----------------------------------------------------------------------------
# Parameters / frames (deterministic; shapes follow the PyTorch __init__)
# ----------------------------------------------------------------------------
def init_params(key, single_dim, pair_dim, proj_dim, n_heads, n_qp, n_vp):
    keys = jax.random.split(key, 7)

    def lin(k, fan_in, fan_out):
        return jax.random.normal(k, (fan_in, fan_out), jnp.float32) / jnp.sqrt(
            jnp.float32(fan_in))

    out_cat_dim = n_heads * (pair_dim + proj_dim + n_vp * 3 + n_vp)
    return {
        "W_qkv": lin(keys[0], single_dim, 3 * n_heads * proj_dim),
        "W_b": lin(keys[1], pair_dim, n_heads),
        "W_qkp": lin(keys[2], single_dim, 2 * n_heads * n_qp * 3),
        "W_vp": lin(keys[3], single_dim, n_heads * n_vp * 3),
        # module inits gamma = zeros; small random values so the distance
        # branch is actually exercised (test-harness choice, still deterministic)
        "gamma": 0.5 * jax.random.normal(keys[4], (n_heads,), jnp.float32),
        "W_out": lin(keys[5], out_cat_dim, single_dim),
        "b_out": 0.1 * jax.random.normal(keys[6], (single_dim,), jnp.float32),
    }


def make_frames(key, n):
    # Proper rotations via Gram-Schmidt (avoids a QR custom call).
    k1, k2, k3 = jax.random.split(key, 3)
    a = jax.random.normal(k1, (n, 3), jnp.float32)
    b = jax.random.normal(k2, (n, 3), jnp.float32)
    e1 = a / jnp.linalg.norm(a, axis=-1, keepdims=True)
    b = b - jnp.sum(b * e1, axis=-1, keepdims=True) * e1
    e2 = b / jnp.linalg.norm(b, axis=-1, keepdims=True)
    e3 = jnp.cross(e1, e2)
    R = jnp.stack([e1, e2, e3], axis=-1)          # det = +1
    t = jax.random.normal(k3, (n, 3), jnp.float32)
    return R, t


def _apply_frames(R, t, x):          # x: (N, P, H, 3)
    return jnp.einsum("nij,nphj->nphi", R, x) + t[:, None, None, :]


def _apply_frames_inverse(R, t, x):  # x: (N, P, H, 3)
    return jnp.einsum("nji,nphj->nphi", R, x - t[:, None, None, :])


def _pad_last(x, multiple):
    pad = (-x.shape[-1]) % multiple
    if pad == 0:
        return x
    return jnp.pad(x, [(0, 0)] * (x.ndim - 1) + [(0, pad)])


# ----------------------------------------------------------------------------
# Forward pass (Pallas kernel for the O(N^2) attention hot path)
# ----------------------------------------------------------------------------
def ipa_forward_pallas(params, single_rep, pair_rep, R, t,
                       *, proj_dim, n_heads, n_qp, n_vp,
                       block_q=256, block_k=256):
    N, _ = single_rep.shape
    H, D = n_heads, proj_dim
    Z = pair_rep.shape[-1]
    sqrt_inv_dim = 1.0 / (proj_dim ** 0.5)
    w_C = (2.0 / (9.0 * n_qp)) ** 0.5
    w_L = (1.0 / 3.0) ** 0.5

    # --- projections (XLA glue) ---
    qkv = single_rep @ params["W_qkv"]
    q, k, v = jnp.split(qkv, 3, axis=-1)
    q = q.reshape(N, D, H)
    k = k.reshape(N, D, H)
    v = v.reshape(N, D, H)

    qk_pts = single_rep @ params["W_qkp"]
    q_pts, k_pts = jnp.split(qk_pts, 2, axis=-1)
    q_pts = q_pts.reshape(N, n_qp, 3, H)
    k_pts = k_pts.reshape(N, n_qp, 3, H)
    v_pts = (single_rep @ params["W_vp"]).reshape(N, n_vp, 3, H)

    qp_glob = _apply_frames(R, t, jnp.moveaxis(q_pts, -1, -2))   # (N, Pq, H, 3)
    kp_glob = _apply_frames(R, t, jnp.moveaxis(k_pts, -1, -2))
    vp_glob = _apply_frames(R, t, jnp.moveaxis(v_pts, -1, -2))   # (N, Pv, H, 3)

    # Centre q/k points by the mean translation (distance-invariant) so the
    # bf16 cross term is well-conditioned even for far-from-origin structures.
    t_center = jnp.mean(t, axis=0)
    qp_c = qp_glob - t_center
    kp_c = kp_glob - t_center

    # --- head-major rearrangement + fused operand construction (glue) ---
    q_h = jnp.transpose(q, (2, 0, 1))                            # (H, N, D)
    k_h = jnp.transpose(k, (2, 0, 1))
    v_h = jnp.transpose(v, (2, 0, 1))
    qp_h = jnp.transpose(qp_c, (2, 0, 1, 3)).reshape(H, N, n_qp * 3)
    kp_h = jnp.transpose(kp_c, (2, 0, 1, 3)).reshape(H, N, n_qp * 3)
    vp_h = jnp.transpose(vp_glob, (2, 0, 1, 3)).reshape(H, N, n_vp * 3)

    c1 = w_L * sqrt_inv_dim                                      # scalar
    c2 = (w_L * 0.5 * w_C) * params["gamma"]                     # (H,)

    # Qcat . Kcat^T = c1*q.k + 2*c2*(qp.kp);  the j-dependent -c2*|kp|^2 term
    # stays in f32 as a side bias; the j-independent -c2*|qp|^2 term is
    # softmax-invariant and dropped.
    qc = jnp.concatenate([c1 * q_h, (2.0 * c2)[:, None, None] * qp_h], axis=-1)
    kc = jnp.concatenate([k_h, kp_h], axis=-1)
    vc = jnp.concatenate([v_h, vp_h], axis=-1)
    qc = _pad_last(qc, 8).astype(jnp.bfloat16)                   # (H, N, Dc)
    kc = _pad_last(kc, 8).astype(jnp.bfloat16)
    vc = _pad_last(vc, 8).astype(jnp.bfloat16)                   # (H, N, Dv)

    kb = -c2[:, None] * jnp.sum(kp_h * kp_h, axis=-1)            # (H, N) f32
    wb = (w_L * params["W_b"]).T                                  # (H, Z) f32
    pair_t = jnp.transpose(pair_rep, (0, 2, 1))                  # (N, Z, N) lane-dense

    out_pair_nhz, out_vc_h = ipa_attention_pallas(
        wb, qc, kc, kb, vc, pair_t, block_q=block_q, block_k=block_k)

    out_val_h = out_vc_h[:, :, :D]                               # (H, N, D)
    out_pts_h = out_vc_h[:, :, D:D + 3 * n_vp]                   # (H, N, 3*Pv)

    # --- back to the PyTorch layouts (glue) ---
    out_pair = jnp.transpose(out_pair_nhz, (0, 2, 1))            # (N, Z, H)
    out_val = jnp.transpose(out_val_h, (1, 2, 0))                # (N, D, H)
    out_pts_glob = jnp.transpose(out_pts_h.reshape(H, N, n_vp, 3),
                                 (1, 2, 0, 3))                   # (N, Pv, H, 3)
    out_pts = _apply_frames_inverse(R, t, out_pts_glob)
    out_pts_norm = jnp.sqrt(jnp.sum(out_pts * out_pts, axis=-1))

    out = jnp.concatenate([
        out_pair.reshape(N, -1),
        out_val.reshape(N, -1),
        out_pts.reshape(N, -1),
        out_pts_norm.reshape(N, -1),
    ], axis=1)
    return out @ params["W_out"] + params["b_out"]


# ----------------------------------------------------------------------------
# Pure-JAX reference (mirrors the PyTorch forward exactly)
# ----------------------------------------------------------------------------
def ipa_forward_ref(params, single_rep, pair_rep, R, t,
                    *, proj_dim, n_heads, n_qp, n_vp):
    N, _ = single_rep.shape
    H, D = n_heads, proj_dim
    sqrt_inv_dim = 1.0 / (proj_dim ** 0.5)
    w_C = (2.0 / (9.0 * n_qp)) ** 0.5
    w_L = (1.0 / 3.0) ** 0.5

    qkv = single_rep @ params["W_qkv"]
    q, k, v = jnp.split(qkv, 3, axis=-1)
    q = q.reshape(N, D, H)
    k = k.reshape(N, D, H)
    v = v.reshape(N, D, H)
    b = pair_rep @ params["W_b"]

    qk_pts = single_rep @ params["W_qkp"]
    q_pts, k_pts = jnp.split(qk_pts, 2, axis=-1)
    q_pts = q_pts.reshape(N, n_qp, 3, H)
    k_pts = k_pts.reshape(N, n_qp, 3, H)
    v_pts = (single_rep @ params["W_vp"]).reshape(N, n_vp, 3, H)

    qp_glob = _apply_frames(R, t, jnp.moveaxis(q_pts, -1, -2))
    kp_glob = _apply_frames(R, t, jnp.moveaxis(k_pts, -1, -2))
    vp_glob = _apply_frames(R, t, jnp.moveaxis(v_pts, -1, -2))

    dp = sqrt_inv_dim * jnp.einsum("idh,jdh->ijh", q, k) + b             # (N,N,H)
    diff = qp_glob[:, None] - kp_glob[None]                              # (N,N,P,H,3)
    dist = jnp.sum(diff ** 2, axis=(-1, -3))                             # (N,N,H)
    scale = params["gamma"] * (w_C / 2.0)
    a = jax.nn.softmax(w_L * (dp - scale * dist), axis=1)

    out_pair = jnp.einsum("ijh,ijz->izh", a, pair_rep)
    out_val = jnp.einsum("ijh,jdh->idh", a, v)
    out_pts = _apply_frames_inverse(R, t, jnp.einsum("ijh,jpht->ipht", a, vp_glob))
    out_pts_norm = jnp.linalg.norm(out_pts, axis=-1)

    out = jnp.concatenate([
        out_pair.reshape(N, -1),
        out_val.reshape(N, -1),
        out_pts.reshape(N, -1),
        out_pts_norm.reshape(N, -1),
    ], axis=1)
    return out @ params["W_out"] + params["b_out"]


# ----------------------------------------------------------------------------
if __name__ == "__main__":
    def run_case(case, N, single_dim, pair_dim, proj_dim, n_heads, n_qp, n_vp,
                 block_q, block_k):
        key = jax.random.fold_in(jax.random.PRNGKey(0), case)
        k_params, k_single, k_pair, k_frames = jax.random.split(key, 4)

        params = init_params(k_params, single_dim, pair_dim, proj_dim,
                             n_heads, n_qp, n_vp)
        single_rep = jax.random.normal(k_single, (N, single_dim), jnp.float32)
        pair_rep = jax.random.normal(k_pair, (N, N, pair_dim), jnp.float32)
        R, t = make_frames(k_frames, N)

        out = jax.block_until_ready(
            ipa_forward_pallas(params, single_rep, pair_rep, R, t,
                               proj_dim=proj_dim, n_heads=n_heads,
                               n_qp=n_qp, n_vp=n_vp,
                               block_q=block_q, block_k=block_k))
        assert out.shape == (N, single_dim), out.shape

        ref = jax.block_until_ready(
            ipa_forward_ref(params, single_rep, pair_rep, R, t,
                            proj_dim=proj_dim, n_heads=n_heads,
                            n_qp=n_qp, n_vp=n_vp))
        max_err = float(jnp.max(jnp.abs(out - ref)))
        # bf16 MXU operands (vs. f32 reference) => slightly looser tolerance.
        assert jnp.allclose(out, ref, atol=3e-2, rtol=3e-2), \
            f"case {case}: max_err={max_err}"

    # Single-tile path (grid 1x1), tiny shapes.
    run_case(0, N=8, single_dim=32, pair_dim=8, proj_dim=16, n_heads=4,
             n_qp=4, n_vp=4, block_q=8, block_k=8)
    # Multi-tile flash path (grid 2x2): exercises the online-softmax
    # rescaling across key blocks and the "parallel" query axis.
    run_case(1, N=256, single_dim=32, pair_dim=8, proj_dim=16, n_heads=4,
             n_qp=4, n_vp=4, block_q=128, block_k=128)

    print("KERNEL_OK")
</pallas_src>

<mosaic_0001>
module attributes {stable_mosaic.version = 11 : i64} {
  func.func @_ipa_attention_kernel(%arg0: i32, %arg1: i32, %arg2: memref<4x8xf32, #tpu.memory_space<vmem>>, %arg3: memref<4x8x32xbf16, #tpu.memory_space<vmem>>, %arg4: memref<4x8x32xbf16, #tpu.memory_space<vmem>>, %arg5: memref<4x8xf32, #tpu.memory_space<vmem>>, %arg6: memref<4x8x32xbf16, #tpu.memory_space<vmem>>, %arg7: memref<8x8x8xf32, #tpu.memory_space<vmem>>, %arg8: memref<8x4x8xf32, #tpu.memory_space<vmem>>, %arg9: memref<4x8x32xf32, #tpu.memory_space<vmem>>, %arg10: memref<4x8x1xf32, #tpu.memory_space<vmem>>, %arg11: memref<4x8x1xf32, #tpu.memory_space<vmem>>, %arg12: memref<8x4x8xf32, #tpu.memory_space<vmem>>, %arg13: memref<4x8x32xf32, #tpu.memory_space<vmem>>) attributes {dimension_semantics = [#tpu.dimension_semantics<parallel>, #tpu.dimension_semantics<arbitrary>], iteration_bounds = array<i64: 1, 1>, scalar_prefetch = 0 : i64, scratch_operands = 4 : i64, tpu.core_type = #tpu.core_type<tc>, window_params = [{pipeline_mode = #tpu.pipeline_mode<synchronous>, transform_indices = @transform_0, window_bounds = array<i64: 4, 8>}, {transform_indices = @transform_1, window_bounds = array<i64: 4, 8, 32>}, {transform_indices = @transform_2, window_bounds = array<i64: 4, 8, 32>}, {transform_indices = @transform_3, window_bounds = array<i64: 4, 8>}, {transform_indices = @transform_4, window_bounds = array<i64: 4, 8, 32>}, {transform_indices = @transform_5, window_bounds = array<i64: 8, 8, 8>}, {transform_indices = @transform_6, window_bounds = array<i64: 8, 4, 8>}, {transform_indices = @transform_7, window_bounds = array<i64: 4, 8, 32>}]} {
    %c0_i32 = arith.constant 0 : i32
    %0 = arith.cmpi eq, %arg1, %c0_i32 : i32
    %1 = arith.extui %0 : i1 to i32
    %c0_i32_0 = arith.constant 0 : i32
    %2 = arith.cmpi ne, %1, %c0_i32_0 : i32
    scf.if %2 {
      %cst_47 = arith.constant 0xFF800000 : f32
      %53 = vector.broadcast %cst_47 : f32 to vector<4x8x1xf32>
      %c0_48 = arith.constant 0 : index
      %c0_49 = arith.constant 0 : index
      %c0_50 = arith.constant 0 : index
      %54 = vector.load %arg10[%c0_48, %c0_49, %c0_50] : memref<4x8x1xf32, #tpu.memory_space<vmem>>, vector<4x8x1xf32>
      tpu.vector_store %arg10[%c0_48, %c0_49, %c0_50], %53 {strides = array<i32>} : memref<4x8x1xf32, #tpu.memory_space<vmem>>, vector<4x8x1xf32>,
      %cst_51 = arith.constant 0.000000e+00 : f32
      %55 = vector.broadcast %cst_51 : f32 to vector<4x8x1xf32>
      %c0_52 = arith.constant 0 : index
      %c0_53 = arith.constant 0 : index
      %c0_54 = arith.constant 0 : index
      %56 = vector.load %arg11[%c0_52, %c0_53, %c0_54] : memref<4x8x1xf32, #tpu.memory_space<vmem>>, vector<4x8x1xf32>
      tpu.vector_store %arg11[%c0_52, %c0_53, %c0_54], %55 {strides = array<i32>} : memref<4x8x1xf32, #tpu.memory_space<vmem>>, vector<4x8x1xf32>,
      %cst_55 = arith.constant 0.000000e+00 : f32
      %57 = vector.broadcast %cst_55 : f32 to vector<8x4x8xf32>
      %c0_56 = arith.constant 0 : index
      %c0_57 = arith.constant 0 : index
      %c0_58 = arith.constant 0 : index
      %58 = vector.load %arg12[%c0_56, %c0_57, %c0_58] : memref<8x4x8xf32, #tpu.memory_space<vmem>>, vector<8x4x8xf32>
      tpu.vector_store %arg12[%c0_56, %c0_57, %c0_58], %57 {strides = array<i32>} : memref<8x4x8xf32, #tpu.memory_space<vmem>>, vector<8x4x8xf32>,
      %cst_59 = arith.constant 0.000000e+00 : f32
      %59 = vector.broadcast %cst_59 : f32 to vector<4x8x32xf32>
      %c0_60 = arith.constant 0 : index
      %c0_61 = arith.constant 0 : index
      %c0_62 = arith.constant 0 : index
      %60 = vector.load %arg13[%c0_60, %c0_61, %c0_62] : memref<4x8x32xf32, #tpu.memory_space<vmem>>, vector<4x8x32xf32>
      tpu.vector_store %arg13[%c0_60, %c0_61, %c0_62], %59 {strides = array<i32>} : memref<4x8x32xf32, #tpu.memory_space<vmem>>, vector<4x8x32xf32>,
    } else {
    }
    %c0 = arith.constant 0 : index
    %c0_1 = arith.constant 0 : index
    %c0_2 = arith.constant 0 : index
    %3 = vector.load %arg3[%c0, %c0_1, %c0_2] : memref<4x8x32xbf16, #tpu.memory_space<vmem>>, vector<4x8x32xbf16>
    %c0_3 = arith.constant 0 : index
    %c0_4 = arith.constant 0 : index
    %c0_5 = arith.constant 0 : index
    %4 = vector.load %arg4[%c0_3, %c0_4, %c0_5] : memref<4x8x32xbf16, #tpu.memory_space<vmem>>, vector<4x8x32xbf16>
    %c0_6 = arith.constant 0 : index
    %c0_7 = arith.constant 0 : index
    %c0_8 = arith.constant 0 : index
    %5 = vector.load %arg6[%c0_6, %c0_7, %c0_8] : memref<4x8x32xbf16, #tpu.memory_space<vmem>>, vector<4x8x32xbf16>
    %c0_9 = arith.constant 0 : index
    %c0_10 = arith.constant 0 : index
    %6 = vector.load %arg5[%c0_9, %c0_10] : memref<4x8xf32, #tpu.memory_space<vmem>>, vector<4x8xf32>
    %c0_11 = arith.constant 0 : index
    %c0_12 = arith.constant 0 : index
    %7 = vector.load %arg2[%c0_11, %c0_12] : memref<4x8xf32, #tpu.memory_space<vmem>>, vector<4x8xf32>
    %c0_13 = arith.constant 0 : index
    %c0_14 = arith.constant 0 : index
    %c0_15 = arith.constant 0 : index
    %8 = vector.load %arg7[%c0_13, %c0_14, %c0_15] : memref<8x8x8xf32, #tpu.memory_space<vmem>>, vector<8x8x8xf32>
    %cst = arith.constant dense<0.000000e+00> : vector<4x8x8xf32>
    %9 = tpu.matmul %3, %4, %cst {dimension_numbers = #tpu.dot_dimension_numbers<[2], [2], [1], [1], [0, 0, 0, 1, 1, 1], [0], [0]>} : vector<4x8x32xbf16>, vector<4x8x32xbf16>, vector<4x8x8xf32> -> vector<4x8x8xf32>
    %10 = vector.shape_cast %7 : vector<4x8xf32> to vector<1x4x8xf32>
    %11 = vector.shape_cast %10 : vector<1x4x8xf32> to vector<1x4x8xf32>
    %12 = vector.broadcast %11 : vector<1x4x8xf32> to vector<8x4x8xf32>
    %cst_16 = arith.constant dense<0.000000e+00> : vector<8x4x8xf32>
    %13 = tpu.matmul %12, %8, %cst_16 {dimension_numbers = #tpu.dot_dimension_numbers<[2], [1], [1], [2], [0, 0, 0, 1, 1, 2], [0], [0]>} : vector<8x4x8xf32>, vector<8x8x8xf32>, vector<8x4x8xf32> -> vector<8x4x8xf32>
    %14 = tpu.transpose %13, [1, 0, 2] : vector<8x4x8xf32> -> vector<4x8x8xf32>
    %15 = arith.addf %9, %14 : vector<4x8x8xf32>
    %16 = vector.shape_cast %6 : vector<4x8xf32> to vector<4x1x8xf32>
    %17 = vector.broadcast %16 : vector<4x1x8xf32> to vector<4x8x8xf32>
    %18 = arith.addf %15, %17 : vector<4x8x8xf32>
    %c0_17 = arith.constant 0 : index
    %c0_18 = arith.constant 0 : index
    %c0_19 = arith.constant 0 : index
    %19 = vector.load %arg10[%c0_17, %c0_18, %c0_19] : memref<4x8x1xf32, #tpu.memory_space<vmem>>, vector<4x8x1xf32>
    %cst_20 = arith.constant dense<0xFF800000> : vector<4x8xf32>
    %20 = vector.multi_reduction <maximumf>, %18, %cst_20 [2] : vector<4x8x8xf32> to vector<4x8xf32>
    %21 = vector.shape_cast %20 : vector<4x8xf32> to vector<4x8x1xf32>
    %22 = arith.maximumf %19, %21 : vector<4x8x1xf32>
    %23 = arith.subf %19, %22 : vector<4x8x1xf32>
    %24 = math.exp %23 : vector<4x8x1xf32>
    %25 = vector.broadcast %22 : vector<4x8x1xf32> to vector<4x8x8xf32>
    %26 = arith.subf %18, %25 : vector<4x8x8xf32>
    %27 = math.exp %26 : vector<4x8x8xf32>
    %c0_21 = arith.constant 0 : index
    %c0_22 = arith.constant 0 : index
    %c0_23 = arith.constant 0 : index
    %28 = vector.load %arg10[%c0_21, %c0_22, %c0_23] : memref<4x8x1xf32, #tpu.memory_space<vmem>>, vector<4x8x1xf32>
    tpu.vector_store %arg10[%c0_21, %c0_22, %c0_23], %22 {strides = array<i32>} : memref<4x8x1xf32, #tpu.memory_space<vmem>>, vector<4x8x1xf32>,
    %c0_24 = arith.constant 0 : index
    %c0_25 = arith.constant 0 : index
    %c0_26 = arith.constant 0 : index
    %29 = vector.load %arg11[%c0_24, %c0_25, %c0_26] : memref<4x8x1xf32, #tpu.memory_space<vmem>>, vector<4x8x1xf32>
    %30 = arith.mulf %24, %29 : vector<4x8x1xf32>
    %cst_27 = arith.constant dense<0.000000e+00> : vector<4x8xf32>
    %31 = vector.multi_reduction <add>, %27, %cst_27 [2] : vector<4x8x8xf32> to vector<4x8xf32>
    %32 = vector.shape_cast %31 : vector<4x8xf32> to vector<4x8x1xf32>
    %33 = arith.addf %30, %32 : vector<4x8x1xf32>
    %c0_28 = arith.constant 0 : index
    %c0_29 = arith.constant 0 : index
    %c0_30 = arith.constant 0 : index
    %34 = vector.load %arg11[%c0_28, %c0_29, %c0_30] : memref<4x8x1xf32, #tpu.memory_space<vmem>>, vector<4x8x1xf32>
    tpu.vector_store %arg11[%c0_28, %c0_29, %c0_30], %33 {strides = array<i32>} : memref<4x8x1xf32, #tpu.memory_space<vmem>>, vector<4x8x1xf32>,
    %c0_31 = arith.constant 0 : index
    %c0_32 = arith.constant 0 : index
    %c0_33 = arith.constant 0 : index
    %35 = vector.load %arg13[%c0_31, %c0_32, %c0_33] : memref<4x8x32xf32, #tpu.memory_space<vmem>>, vector<4x8x32xf32>
    %36 = vector.broadcast %24 : vector<4x8x1xf32> to vector<4x8x32xf32>
    %37 = arith.mulf %36, %35 : vector<4x8x32xf32>
    %38 = arith.truncf %27 : vector<4x8x8xf32> to vector<4x8x8xbf16>
    %cst_34 = arith.constant dense<0.000000e+00> : vector<4x8x32xf32>
    %39 = tpu.matmul %38, %5, %cst_34 {dimension_numbers = #tpu.dot_dimension_numbers<[2], [1], [1], [2], [0, 0, 0, 1, 1, 2], [0], [0]>} : vector<4x8x8xbf16>, vector<4x8x32xbf16>, vector<4x8x32xf32> -> vector<4x8x32xf32>
    %40 = arith.addf %37, %39 : vector<4x8x32xf32>
    %c0_35 = arith.constant 0 : index
    %c0_36 = arith.constant 0 : index
    %c0_37 = arith.constant 0 : index
    %41 = vector.load %arg13[%c0_35, %c0_36, %c0_37] : memref<4x8x32xf32, #tpu.memory_space<vmem>>, vector<4x8x32xf32>
    tpu.vector_store %arg13[%c0_35, %c0_36, %c0_37], %40 {strides = array<i32>} : memref<4x8x32xf32, #tpu.memory_space<vmem>>, vector<4x8x32xf32>,
    %42 = tpu.transpose %27, [1, 0, 2] : vector<4x8x8xf32> -> vector<8x4x8xf32>
    %43 = tpu.transpose %24, [1, 0, 2] : vector<4x8x1xf32> -> vector<8x4x1xf32>
    %c0_38 = arith.constant 0 : index
    %c0_39 = arith.constant 0 : index
    %c0_40 = arith.constant 0 : index
    %44 = vector.load %arg12[%c0_38, %c0_39, %c0_40] : memref<8x4x8xf32, #tpu.memory_space<vmem>>, vector<8x4x8xf32>
    %45 = vector.broadcast %43 : vector<8x4x1xf32> to vector<8x4x8xf32>
    %46 = arith.mulf %45, %44 : vector<8x4x8xf32>
    %cst_41 = arith.constant dense<0.000000e+00> : vector<8x4x8xf32>
    %47 = tpu.matmul %42, %8, %cst_41 {dimension_numbers = #tpu.dot_dimension_numbers<[2], [2], [1], [1], [0, 0, 0, 1, 1, 1], [0], [0]>} : vector<8x4x8xf32>, vector<8x8x8xf32>, vector<8x4x8xf32> -> vector<8x4x8xf32>
    %48 = arith.addf %46, %47 : vector<8x4x8xf32>
    %c0_42 = arith.constant 0 : index
    %c0_43 = arith.constant 0 : index
    %c0_44 = arith.constant 0 : index
    %49 = vector.load %arg12[%c0_42, %c0_43, %c0_44] : memref<8x4x8xf32, #tpu.memory_space<vmem>>, vector<8x4x8xf32>
    tpu.vector_store %arg12[%c0_42, %c0_43, %c0_44], %48 {strides = array<i32>} : memref<8x4x8xf32, #tpu.memory_space<vmem>>, vector<8x4x8xf32>,
    %c0_i32_45 = arith.constant 0 : i32
    %50 = arith.cmpi eq, %arg1, %c0_i32_45 : i32
    %51 = arith.extui %50 : i1 to i32
    %c0_i32_46 = arith.constant 0 : i32
    %52 = arith.cmpi ne, %51, %c0_i32_46 : i32
    scf.if %52 {
      %c0_47 = arith.constant 0 : index
      %c0_48 = arith.constant 0 : index
      %c0_49 = arith.constant 0 : index
      %53 = vector.load %arg11[%c0_47, %c0_48, %c0_49] : memref<4x8x1xf32, #tpu.memory_space<vmem>>, vector<4x8x1xf32>
      %cst_50 = arith.constant 1.000000e+00 : f32
      %54 = vector.broadcast %cst_50 : f32 to vector<4x8x1xf32>
      %55 = arith.divf %54, %53 : vector<4x8x1xf32>
      %c0_51 = arith.constant 0 : index
      %c0_52 = arith.constant 0 : index
      %c0_53 = arith.constant 0 : index
      %56 = vector.load %arg13[%c0_51, %c0_52, %c0_53] : memref<4x8x32xf32, #tpu.memory_space<vmem>>, vector<4x8x32xf32>
      %57 = vector.broadcast %55 : vector<4x8x1xf32> to vector<4x8x32xf32>
      %58 = arith.mulf %56, %57 : vector<4x8x32xf32>
      %c0_54 = arith.constant 0 : index
      %c0_55 = arith.constant 0 : index
      %c0_56 = arith.constant 0 : index
      %59 = vector.load %arg9[%c0_54, %c0_55, %c0_56] : memref<4x8x32xf32, #tpu.memory_space<vmem>>, vector<4x8x32xf32>
      tpu.vector_store %arg9[%c0_54, %c0_55, %c0_56], %58 {strides = array<i32>} : memref<4x8x32xf32, #tpu.memory_space<vmem>>, vector<4x8x32xf32>,
      %60 = tpu.transpose %55, [1, 0, 2] : vector<4x8x1xf32> -> vector<8x4x1xf32>
      %c0_57 = arith.constant 0 : index
      %c0_58 = arith.constant 0 : index
      %c0_59 = arith.constant 0 : index
      %61 = vector.load %arg12[%c0_57, %c0_58, %c0_59] : memref<8x4x8xf32, #tpu.memory_space<vmem>>, vector<8x4x8xf32>
      %62 = vector.broadcast %60 : vector<8x4x1xf32> to vector<8x4x8xf32>
      %63 = arith.mulf %61, %62 : vector<8x4x8xf32>
      %c0_60 = arith.constant 0 : index
      %c0_61 = arith.constant 0 : index
      %c0_62 = arith.constant 0 : index
      %64 = vector.load %arg8[%c0_60, %c0_61, %c0_62] : memref<8x4x8xf32, #tpu.memory_space<vmem>>, vector<8x4x8xf32>
      tpu.vector_store %arg8[%c0_60, %c0_61, %c0_62], %63 {strides = array<i32>} : memref<8x4x8xf32, #tpu.memory_space<vmem>>, vector<8x4x8xf32>,
    } else {
    }
    return
  }
  func.func @transform_0(%arg0: i32, %arg1: i32) -> (i32, i32) {
    %c0_i32 = arith.constant 0 : i32
    %c0_i32_0 = arith.constant 0 : i32
    %c0_i32_1 = arith.constant 0 : i32
    return %c0_i32, %c0_i32_0 : i32, i32
  }
  func.func @transform_1(%arg0: i32, %arg1: i32) -> (i32, i32, i32) {
    %c0_i32 = arith.constant 0 : i32
    %c0_i32_0 = arith.constant 0 : i32
    %c0_i32_1 = arith.constant 0 : i32
    return %c0_i32, %arg0, %c0_i32_0 : i32, i32, i32
  }
  func.func @transform_2(%arg0: i32, %arg1: i32) -> (i32, i32, i32) {
    %c0_i32 = arith.constant 0 : i32
    %c0_i32_0 = arith.constant 0 : i32
    %c0_i32_1 = arith.constant 0 : i32
    return %c0_i32, %arg1, %c0_i32_0 : i32, i32, i32
  }
  func.func @transform_3(%arg0: i32, %arg1: i32) -> (i32, i32) {
    %c0_i32 = arith.constant 0 : i32
    %c0_i32_0 = arith.constant 0 : i32
    return %c0_i32, %arg1 : i32, i32
  }
  func.func @transform_4(%arg0: i32, %arg1: i32) -> (i32, i32, i32) {
    %c0_i32 = arith.constant 0 : i32
    %c0_i32_0 = arith.constant 0 : i32
    %c0_i32_1 = arith.constant 0 : i32
    return %c0_i32, %arg1, %c0_i32_0 : i32, i32, i32
  }
  func.func @transform_5(%arg0: i32, %arg1: i32) -> (i32, i32, i32) {
    %c0_i32 = arith.constant 0 : i32
    %c0_i32_0 = arith.constant 0 : i32
    return %arg0, %c0_i32, %arg1 : i32, i32, i32
  }
  func.func @transform_6(%arg0: i32, %arg1: i32) -> (i32, i32, i32) {
    %c0_i32 = arith.constant 0 : i32
    %c0_i32_0 = arith.constant 0 : i32
    %c0_i32_1 = arith.constant 0 : i32
    return %arg0, %c0_i32, %c0_i32_0 : i32, i32, i32
  }
  func.func @transform_7(%arg0: i32, %arg1: i32) -> (i32, i32, i32) {
    %c0_i32 = arith.constant 0 : i32
    %c0_i32_0 = arith.constant 0 : i32
    %c0_i32_1 = arith.constant 0 : i32
    return %c0_i32, %arg0, %c0_i32_0 : i32, i32, i32
  }
}

</mosaic_0001>

<bundles_post_ra>
// kernel: tpu_custom_call.1
= control target key start
LH: loop header
LB: loop body
LE: loop exit
PB: predicated region body
PF: predicated region fallthrough
CT: control target
= control target key end

     0   :  { %13 = vsyncpa [#allocation7], 0  ;;  %s3242_s0 = inlined_call_operand.hbm [shape: f32[4,8], index: 0, kind: input, shape index: {}]   ;;  %s3243_s1 = inlined_call_operand.hbm [shape: bf16[4,8,32], index: 1, kind: input, shape index: {}]   ;;  %s3244_s2 = inlined_call_operand.hbm [shape: bf16[4,8,32], index: 2, kind: input, shape index: {}]   ;;  %s3245_s3 = inlined_call_operand.vmem [shape: f32[4,8], index: 3, kind: input, shape index: {}]   ;;  %s3246_s4 = inlined_call_operand.hbm [shape: bf16[4,8,32], index: 4, kind: input, shape index: {}]   ;;  %s3247_s5 = inlined_call_operand.hbm [shape: f32[8,8,8], index: 5, kind: input, shape index: {}]   ;;  %s3248_s6 = inlined_call_operand.hbm [shape: f32[8,4,8], index: 6, kind: output, shape index: {0}]   ;;  %s3249_s7 = inlined_call_operand.hbm [shape: f32[4,8,32], index: 7, kind: output, shape index: {1}]  }
   0x1   :  { %14 = vsyncpa [#allocation10], 0 }
   0x2   :  { %15 = vsyncpa [#allocation13], 0 }
   0x3   :  { %16 = vsyncpa [#allocation8], 0 }
   0x4   :  { %17 = vsyncpa [#allocation17], 0  ;;  %s2779_s24 = smov [#allocation9]   ;;  %s2615_s28 = scalar_lea.hbm %s3243_s1, 256 }
   0x5   :  { %s33_s25 = sshll.u32 %s2779_s24, 4  ;;  %p2616_p0 = scmp.ne.s32.totalorder %s3243_s1, %s2615_s28  ;;  %s34_s25 = int_to_ptr.vmem [resolvable:$true] %s33_s25 }
   0x6   :  { %p2619_p1 = scmp.lt.u32.totalorder %s2615_s28, %s3243_s1 }
   0x8   :  { %p2621_p2 = pnand %p2619_p1, %p2616_p0 }
   0xa   :  { %2624 = shalt.err (!%p2621_p2)
}
   0xb   :  { %s2625_s10 = scalar_lea.vmem %s34_s25, 256  ;;  %p2630_p4 = scmp.lt.s32.totalorder %s34_s25, %s34_s25 }
   0xc   :  { %p2626_p3 = scmp.ne.s32.totalorder %s34_s25, %s2625_s10  ;;  %p2631_p5 = scmp.lt.s32.totalorder %s2625_s10, %s2625_s10 }
   0xe   :  { %p2632_p6 = por %p2631_p5, %p2630_p4 }
  0x10   :  { %p2633_p7 = pnand %p2632_p6, %p2626_p3 }
  0x12   :  { %2636 = shalt.err (!%p2633_p7)
}
  0x13   :  { %s2780_s11 = smov 64   ;;  %s2781_s12 = smov 4  }
  0x14   :  { %39 = dma.hbm_to_vmem [thread:$0]  %s3243_s1, 256, %s34_s25, [#allocation10], %s2780_s11, %s2780_s11, %s2781_s12  }
  0x15   :  { %s2782_s15 = smov [#allocation12]   ;;  %s2783_s17 = smov [#allocation6]  }
  0x16   :  { %s59_s16 = sshll.u32 %s2782_s15, 4  ;;  %s24_s18 = sshll.u32 %s2783_s17, 4  ;;  %s60_s16 = int_to_ptr.vmem [resolvable:$true] %s59_s16  ;;  %s25_s18 = int_to_ptr.vmem [resolvable:$true] %s24_s18 }
  0x17   :  { %s2637_s21 = scalar_lea.hbm %s3246_s4, 256 }
  0x18   :  { %p2638_p8 = scmp.ne.s32.totalorder %s3246_s4, %s2637_s21  ;;  %p2641_p9 = scmp.lt.u32.totalorder %s2637_s21, %s3246_s4 }
  0x1a   :  { %p2643_p10 = pnand %p2641_p9, %p2638_p8 }
  0x1c   :  { %2646 = shalt.err (!%p2643_p10)
}
  0x1d   :  { %s2647_s1 = scalar_lea.vmem %s60_s16, 256  ;;  %p2652_p12 = scmp.lt.s32.totalorder %s60_s16, %s60_s16 }
  0x1e   :  { %p2648_p11 = scmp.ne.s32.totalorder %s60_s16, %s2647_s1  ;;  %p2653_p13 = scmp.lt.s32.totalorder %s2647_s1, %s2647_s1 }
  0x20   :  { %p2654_p0 = por %p2653_p13, %p2652_p12 }
  0x22   :  { %p2655_p1 = pnand %p2654_p0, %p2648_p11 }
  0x24   :  { %2658 = shalt.err (!%p2655_p1)
}
  0x25   :  { %65 = dma.hbm_to_vmem [thread:$0]  %s3246_s4, 256, %s60_s16, [#allocation13], %s2780_s11, %s2780_s11, %s2781_s12  }
  0x26   :  { %s2659_s30 = scalar_lea.hbm %s3242_s0, 64 }
  0x27   :  { %p2660_p2 = scmp.ne.s32.totalorder %s3242_s0, %s2659_s30  ;;  %p2663_p3 = scmp.lt.u32.totalorder %s2659_s30, %s3242_s0 }
  0x29   :  { %p2665_p4 = pnand %p2663_p3, %p2660_p2 }
  0x2b   :  { %2668 = shalt.err (!%p2665_p4)
}
  0x2c   :  { %s2669_s14 = scalar_lea.vmem %s25_s18, 64  ;;  %p2674_p6 = scmp.lt.s32.totalorder %s25_s18, %s25_s18 }
  0x2d   :  { %p2670_p5 = scmp.ne.s32.totalorder %s25_s18, %s2669_s14  ;;  %p2675_p7 = scmp.lt.s32.totalorder %s2669_s14, %s2669_s14 }
  0x2f   :  { %p2676_p8 = por %p2675_p7, %p2674_p6 }
  0x31   :  { %p2677_p9 = pnand %p2676_p8, %p2670_p5 }
  0x33   :  { %2680 = shalt.err (!%p2677_p9)
}
  0x34   :  { %27 = dma.hbm_to_vmem [thread:$0]  %s3242_s0, 64, %s25_s18, [#allocation7]  }
  0x35   :  { %s2784_s16 = smov [#allocation11]   ;;  %s2785_s19 = smov [#allocation14]  }
  0x36   :  { %s45_s17 = sshll.u32 %s2784_s16, 4  ;;  %s71_s20 = sshll.u32 %s2785_s19, 4  ;;  %s46_s17 = int_to_ptr.vmem [resolvable:$true] %s45_s17  ;;  %s72_s20 = int_to_ptr.vmem [resolvable:$true] %s71_s20 }
  0x37   :  { %s2681_s23 = scalar_lea.hbm %s3244_s2, 256 }
  0x38   :  { %p2682_p10 = scmp.ne.s32.totalorder %s3244_s2, %s2681_s23  ;;  %p2685_p11 = scmp.lt.u32.totalorder %s2681_s23, %s3244_s2 }
  0x3a   :  { %p2687_p12 = pnand %p2685_p11, %p2682_p10 }
  0x3c   :  { %2690 = shalt.err (!%p2687_p12)
}
  0x3d   :  { %s2691_s0 = scalar_lea.vmem %s46_s17, 256  ;;  %p2696_p0 = scmp.lt.s32.totalorder %s46_s17, %s46_s17 }
  0x3e   :  { %p2692_p13 = scmp.ne.s32.totalorder %s46_s17, %s2691_s0  ;;  %p2697_p1 = scmp.lt.s32.totalorder %s2691_s0, %s2691_s0 }
  0x40   :  { %p2698_p2 = por %p2697_p1, %p2696_p0 }
  0x42   :  { %p2699_p3 = pnand %p2698_p2, %p2692_p13 }
  0x44   :  { %2702 = shalt.err (!%p2699_p3)
}
  0x45   :  { %51 = dma.hbm_to_vmem [thread:$0]  %s3244_s2, 256, %s46_s17, [#allocation10], %s2780_s11, %s2780_s11, %s2781_s12  }
  0x46   :  { %s2703_s30 = scalar_lea.hbm %s3247_s5, 1024 }
  0x47   :  { %p2704_p4 = scmp.ne.s32.totalorder %s3247_s5, %s2703_s30  ;;  %p2707_p5 = scmp.lt.u32.totalorder %s2703_s30, %s3247_s5 }
  0x49   :  { %p2709_p6 = pnand %p2707_p5, %p2704_p4 }
  0x4b   :  { %2712 = shalt.err (!%p2709_p6)
}
  0x4c   :  { %s2713_s14 = scalar_lea.vmem %s72_s20, 1024  ;;  %p2718_p8 = scmp.lt.s32.totalorder %s72_s20, %s72_s20 }
  0x4d   :  { %p2714_p7 = scmp.ne.s32.totalorder %s72_s20, %s2713_s14  ;;  %p2719_p9 = scmp.lt.s32.totalorder %s2713_s14, %s2713_s14 }
  0x4f   :  { %p2720_p10 = por %p2719_p9, %p2718_p8 }
  0x51   :  { %p2721_p11 = pnand %p2720_p10, %p2714_p7 }
  0x53   :  { %2724 = shalt.err (!%p2721_p11)
}
  0x54   :  { %s2786_s2 = smov 128   ;;  %s2787_s4 = smov 8  }
  0x55   :  { %77 = dma.hbm_to_vmem [thread:$0]  %s3247_s5, 1024, %s72_s20, [#allocation13], %s2786_s2, %s2786_s2, %s2787_s4  }
  0x56   :  { %2769 = dma.done.wait [#allocation7], 64  }
  0x57   :  { %2770 = vsyncadd [#allocation7], 4294967232 }
  0x58   :  { %2771 = dma.done.wait [#allocation10], 512  }
  0x59   :  { %2772 = vsyncadd [#allocation10], 4294966784 }
  0x5a   :  { %2773 = dma.done.wait [#allocation13], 1280  }
  0x5b   :  { %2774 = vsyncadd [#allocation13], 4294966016  ;;  %vm116_vm0 = vcmask 261120   ;;  %v2788_v0 = vmov 0.0   ;;  %vm2789_vm1 = vmmov 0   ;;  %vm143_vm2 = vcmask 64512  }
  0x5c   :  { %2443 = vmatprep.subr.mxu0 %v2788_v0  ;;  %2448 = vmatprep.subr.mxu1 %v2788_v0  ;;  %117 = vst.msk [vmem:[#allocation5] sm:$0xff] %vm116_vm0, %v2788_v0  ;;  %118 = vst.msk [vmem:[#allocation5 + $0x8] sm:$0xff] %vm116_vm0, %v2788_v0  ;;  %v2923_v1 = vld [vmem:[#allocation14] sm:$0xff]  ;;  %v2925_v2 = vld [vmem:[#allocation14 + $0x8] sm:$0xff]  ;;  %vm98_vm3 = vcmask 7168   ;;  %v2790_v22 = vmov -inf   ;;  %v711_v25 = vlaneseq }
  0x5d   :  { %119 = vst.msk [vmem:[#allocation5 + $0x10] sm:$0xff] %vm116_vm0, %v2788_v0  ;;  %120 = vst.msk [vmem:[#allocation5 + $0x18] sm:$0xff] %vm116_vm0, %v2788_v0  ;;  %2445 = vmatprep.mubr.msk.f32.mxu0 %vm2789_vm1, %v2788_v0  ;;  %2450 = vmatprep.mubr.msk.f32.mxu1 %vm2789_vm1, %v2788_v0  ;;  %v134_v3 = vld [vmem:[#allocation6] sm:$0xf]  ;;  %v2929_v4 = vld [vmem:[#allocation14 + $0x10] sm:$0xff]  ;;  %vm1141_vm4 = vcmask 1043456  }
  0x5e   :  { %2444 = vmatpush3.msra.mxu0 %v2923_v1  ;;  %2449 = vmatpush3.msra.mxu1 %v2925_v2  ;;  %v2931_v5 = vld [vmem:[#allocation14 + $0x18] sm:$0xff]  ;;  %v2943_v6 = vld [vmem:[#allocation14 + $0x20] sm:$0xff]  ;;  %v2945_v7 = vld [vmem:[#allocation14 + $0x28] sm:$0xff]  ;;  %99 = vst.msk [vmem:[#allocation2] sm:$0xff] %vm98_vm3, %v2790_v22  ;;  %v2791_v23 = vmov 1983009808  }
  0x5f   :  { %2446 = vmatmul.mubr.msk.f32.vlgmr.msra.gmra.mrb[0].mxu0 %vm143_vm2, %v134_v3  ;;  %2451 = vmatmul.mubr.msk.f32.vlgmr.msra.gmra.mrb[0].mxu1 %vm143_vm2, %v134_v3  ;;  %v2957_v8 = vld [vmem:[#allocation14 + $0x30] sm:$0xff]  ;;  %v2959_v9 = vld [vmem:[#allocation14 + $0x38] sm:$0xff]  ;;  %v125_v10 = vld [vmem:[#allocation11] sm:$0xf]  ;;  %100 = vst.msk [vmem:[#allocation2 + $0x8] sm:$0xff] %vm98_vm3, %v2790_v22  ;;  %v709_v24 = vunpack.c.l.s4 %v2791_v23  ;;  %v712_v27 = vshrl.u32 %v711_v25, 7 }
  0x60   :  { %2453 = vmatprep.subr.mxu0 %v2788_v0  ;;  %2458 = vmatprep.subr.mxu1 %v2788_v0  ;;  %v126_v11 = vld [vmem:[#allocation11 + $0x4] sm:$0xf]  ;;  %v780_v12 = vsel %vm116_vm0, %v125_v10, 0  ;;  %v127_v14 = vld [vmem:[#allocation11 + $0x8] sm:$0xf]  ;;  %101 = vst.msk [vmem:[#allocation2 + $0x10] sm:$0xff] %vm98_vm3, %v2790_v22 }
  0x61   :  { %2454 = vmatpush3.msra.mxu0 %v2929_v4  ;;  %2459 = vmatpush3.msra.mxu1 %v2931_v5  ;;  %v826_v13 = vsel %vm116_vm0, %v126_v11, 0  ;;  %v128_v15 = vld [vmem:[#allocation11 + $0xc] sm:$0xf]  ;;  %v121_v16 = vld [vmem:[#allocation9] sm:$0xf]  ;;  %v872_v18 = vsel %vm116_vm0, %v127_v14, 0  ;;  %v710_v26 = vunpack.c.0.s8 %v709_v24 }
  0x62   :  { %2455 = vmatprep.mubr.msk.f32.mxu0 %vm2789_vm1, %v2788_v0  ;;  %2460 = vmatprep.mubr.msk.f32.mxu1 %vm2789_vm1, %v2788_v0  ;;  %v122_v17 = vld [vmem:[#allocation9 + $0x4] sm:$0xf]  ;;  %v918_v19 = vsel %vm116_vm0, %v128_v15, 0  ;;  %v123_v20 = vld [vmem:[#allocation9 + $0x8] sm:$0xf]  ;;  %102 = vst.msk [vmem:[#allocation2 + $0x18] sm:$0xff] %vm98_vm3, %v2790_v22 }
  0x63   :  { %2456 = vmatmul.mubr.msk.f32.vlgmr.msra.gmra.mrb[2].mxu0 %vm143_vm2, %v134_v3  ;;  %2461 = vmatmul.mubr.msk.f32.vlgmr.msra.gmra.mrb[2].mxu1 %vm143_vm2, %v134_v3  ;;  %v124_v21 = vld [vmem:[#allocation9 + $0xc] sm:$0xf]  ;;  %103 = vst.msk [vmem:[#allocation3] sm:$0xff] %vm98_vm3, %v2788_v0  ;;  %104 = vst.msk [vmem:[#allocation3 + $0x8] sm:$0xff] %vm98_vm3, %v2788_v0  ;;  %v3011_v32 = vsub.s32 %v710_v26, %v712_v27  ;;  %v2792_v41 = vmov 1966171168  }
  0x64   :  { %2463 = vmatprep.subr.mxu0 %v2788_v0  ;;  %2468 = vmatprep.subr.mxu1 %v2788_v0  ;;  %105 = vst.msk [vmem:[#allocation3 + $0x10] sm:$0xff] %vm98_vm3, %v2788_v0  ;;  %106 = vst.msk [vmem:[#allocation3 + $0x18] sm:$0xff] %vm98_vm3, %v2788_v0  ;;  %v970_v42 = vunpack.c.l.s4 %v2792_v41  ;;  %v2793_v43 = vmov 1934713408   ;;  %vm107_vm5 = vcmask 60416  }
  0x65   :  { %2464 = vmatpush3.msra.mxu0 %v2943_v6  ;;  %2469 = vmatpush3.msra.mxu1 %v2945_v7  ;;  %v742_v44 = vunpack.c.l.s4 %v2793_v43  ;;  %v2374_v59 = vld.sshfl [vmem:[%s3245_s3] sm:$0x33 pattern:$0x75316420]  ;;  %109 = vst.msk [vmem:[#allocation4 + $0x4] sm:$0xf] %vm107_vm5, %v2788_v0 }
  0x66   :  { %2465 = vmatprep.mubr.msk.f32.mxu0 %vm2789_vm1, %v2788_v0  ;;  %2470 = vmatprep.mubr.msk.f32.mxu1 %vm2789_vm1, %v2788_v0  ;;  %v971_v51 = vunpack.c.0.s8 %v970_v42  ;;  %108 = vst.msk [vmem:[#allocation4] sm:$0xf] %vm107_vm5, %v2788_v0  ;;  %110 = vst.msk [vmem:[#allocation4 + $0x8] sm:$0xf] %vm107_vm5, %v2788_v0  ;;  %s2795_s3 = smov [#allocation16]  }
  0x67   :  { %2473 = vmatprep.subr.mxu0 %v2788_v0  ;;  %2478 = vmatprep.subr.mxu1 %v2788_v0  ;;  %v743_v52 = vunpack.c.0.s8 %v742_v44  ;;  %111 = vst.msk [vmem:[#allocation4 + $0xc] sm:$0xf] %vm107_vm5, %v2788_v0  ;;  %112 = vst.msk [vmem:[#allocation4 + $0x10] sm:$0xf] %vm107_vm5, %v2788_v0  ;;  %s2344_s19 = sshll.u32 %s2795_s3, 4  ;;  %s2345_s19 = int_to_ptr.vmem [resolvable:$true] %s2344_s19 }
  0x68   :  { %2466 = vmatmul.mubr.msk.f32.vlgmr.msra.gmra.mrb[4].mxu0 %vm143_vm2, %v134_v3  ;;  %2471 = vmatmul.mubr.msk.f32.vlgmr.msra.gmra.mrb[4].mxu1 %vm143_vm2, %v134_v3  ;;  %v974_v60 = vsub.s32 %v971_v51, %v712_v27  ;;  %113 = vst.msk [vmem:[#allocation4 + $0x14] sm:$0xf] %vm107_vm5, %v2788_v0  ;;  %114 = vst.msk [vmem:[#allocation4 + $0x18] sm:$0xf] %vm107_vm5, %v2788_v0  ;;  %s2725_s20 = scalar_lea.vmem %s2345_s19, 512  ;;  %p2730_p13 = scmp.lt.s32.totalorder %s2345_s19, %s2345_s19 }
  0x69   :  { %2474 = vmatpush3.msra.mxu0 %v2957_v8  ;;  %2479 = vmatpush3.msra.mxu1 %v2959_v9  ;;  %v3020_v63 = vsub.s32 %v743_v52, %v712_v27  ;;  %115 = vst.msk [vmem:[#allocation4 + $0x1c] sm:$0xf] %vm107_vm5, %v2788_v0  ;;  %p2726_p12 = scmp.ne.s32.totalorder %s2345_s19, %s2725_s20  ;;  %p2731_p0 = scmp.lt.s32.totalorder %s2725_s20, %s2725_s20 }
  0x6a   :  { %2475 = vmatprep.mubr.msk.f32.mxu0 %vm2789_vm1, %v2788_v0  ;;  %2480 = vmatprep.mubr.msk.f32.mxu1 %vm2789_vm1, %v2788_v0 }
  0x6b   :  { %2483 = vmatprep.subr.bf16.mxu0 %v2788_v0  ;;  %2489 = vmatprep.subr.bf16.mxu1 %v2788_v0  ;;  %p2732_p1 = por %p2731_p0, %p2730_p13 }
  0x6c   :  { %2476 = vmatmul.mubr.msk.f32.vlgmr.msra.gmra.mrb[6].mxu0 %vm143_vm2, %v134_v3  ;;  %2481 = vmatmul.mubr.msk.f32.vlgmr.msra.gmra.mrb[6].mxu1 %vm143_vm2, %v134_v3  ;;  %v968_v3 = vcombine.high %v2374_v59, %v2374_v59 }
  0x6d   :  { %2485 = vmatprep.mubr.msk.bf16.mxu0 %vm2789_vm1, %v2788_v0  ;;  %2491 = vmatprep.mubr.msk.bf16.mxu1 %vm2789_vm1, %v2788_v0  ;;  %p2733_p2 = pnand %p2732_p1, %p2726_p12 }
  0x70   :  { %2484 = vmatpush3.bf16.xpose.msra.mxu0 %v780_v12  ;;  %2490 = vmatpush3.bf16.xpose.msra.mxu1 %v826_v13  ;;  %v975_v12 = vrot.slane %v2374_v59, %v974_v60  ;;  %v987_v13 = vsub.s32 0, %v712_v27  ;;  %v1009_v59 = vld [vmem:[#allocation2] sm:$0xff] }
  0x71   :  { %2495 = vmatprep.subr.bf16.mxu0 %v2788_v0  ;;  %2501 = vmatprep.subr.bf16.mxu1 %v2788_v0 }
  0x72   :  { %v988_v23 = vrot.slane %v975_v12, %v987_v13 }
  0x77   :  { %2486 = vmatmul.mubr.msk.bf16.vlgmr.msra.gmra.mrb[8].mxu0 %vm116_vm0, %v121_v16  ;;  %2492 = vmatmul.mubr.msk.bf16.vlgmr.msra.gmra.mrb[8].mxu1 %vm116_vm0, %v122_v17 }
  0x78   :  { %2496 = vmatpush3.bf16.xpose.msra.mxu0 %v872_v18  ;;  %2502 = vmatpush3.bf16.xpose.msra.mxu1 %v918_v19  ;;  %v982_v18 = vrot.slane %v968_v3, %v974_v60 }
  0x79   :  { %2497 = vmatprep.mubr.msk.bf16.mxu0 %vm2789_vm1, %v2788_v0  ;;  %2503 = vmatprep.mubr.msk.bf16.mxu1 %vm2789_vm1, %v2788_v0 }
  0x7a   :  { %2507 = vmatprep.subr.bf16.mxu0 %v2788_v0  ;;  %2513 = vmatprep.subr.bf16.mxu1 %v2788_v0 }
  0x7f   :  { %2498 = vmatmul.mubr.msk.bf16.vlgmr.msra.gmra.mrb[12].mxu0 %vm116_vm0, %v123_v20  ;;  %2504 = vmatmul.mubr.msk.bf16.vlgmr.msra.gmra.mrb[12].mxu1 %vm116_vm0, %v124_v21 }
  0x80   :  { %2509 = vmatprep.mubr.msk.bf16.mxu0 %vm2789_vm1, %v2788_v0  ;;  %2515 = vmatprep.mubr.msk.bf16.mxu1 %vm2789_vm1, %v2788_v0 }
 0x132   :  { %v213_v28 = vpop.f32.mrb[0].mxu0  ;;  %v283_v29 = vpop.f32.mrb[0].mxu1 }
 0x133   :  { %v2447_v30 = vpop.f32.mrb[1].mxu0  ;;  %v2452_v31 = vpop.f32.mrb[1].mxu1 }
 0x134   :  { %v992_v30 = vrot.slane %v982_v18, %v987_v13 }
 0x136   :  { %v353_v33 = vpop.f32.mrb[2].mxu0  ;;  %v423_v34 = vpop.f32.mrb[2].mxu1 }
 0x137   :  { %v707_v35 = vcombine.low %v213_v28, %v353_v33  ;;  %v715_v36 = vcombine.low %v283_v29, %v423_v34  ;;  %v2457_v37 = vpop.f32.mrb[3].mxu0  ;;  %v2462_v38 = vpop.f32.mrb[3].mxu1 }
 0x138   :  { %v983_v37 = vcombine.high %v975_v12, %v975_v12  ;;  %v1011_v12 = vld [vmem:[#allocation2 + $0x10] sm:$0xff] }
 0x139   :  { %v714_v39 = vrot.slane %v707_v35, %v3011_v32  ;;  %v722_v40 = vrot.slane %v715_v36, %v3011_v32 }
 0x13a   :  { %v996_v41 = vrot.slane %v983_v37, %v987_v13 }
 0x13b   :  { %v739_v45 = vcombine.low %v714_v39, %v722_v40  ;;  %v740_v46 = vcombine.high %v714_v39, %v722_v40  ;;  %v493_v47 = vpop.f32.mrb[4].mxu0  ;;  %v563_v48 = vpop.f32.mrb[4].mxu1  ;;  %v984_v40 = vcombine.high %v982_v18, %v982_v18 }
 0x13c   :  { %v2467_v49 = vpop.f32.mrb[5].mxu0  ;;  %v2472_v50 = vpop.f32.mrb[5].mxu1 }
 0x13d   :  { %v747_v14 = vrot.slane %v739_v45, %v3020_v63  ;;  %v754_v16 = vrot.slane %v740_v46, %v3020_v63  ;;  %v1000_v49 = vrot.slane %v984_v40, %v987_v13  ;;  %v131_v40 = vld [vmem:[#allocation12 + $0x8] sm:$0xf] }
 0x13f   :  { %v633_v53 = vpop.f32.mrb[6].mxu0  ;;  %v703_v54 = vpop.f32.mrb[6].mxu1 }
 0x140   :  { %v723_v55 = vcombine.low %v493_v47, %v633_v53  ;;  %v731_v56 = vcombine.low %v563_v48, %v703_v54  ;;  %v2477_v57 = vpop.f32.mrb[7].mxu0  ;;  %v2482_v58 = vpop.f32.mrb[7].mxu1 }
 0x141   :  { %v2794_v58 = vmov 0  }
 0x142   :  { %v730_v61 = vrot.slane %v723_v55, %v3011_v32  ;;  %v738_v62 = vrot.slane %v731_v56, %v3011_v32  ;;  %2589 = vset.pattern.permute.xlu0 %v2794_v58  ;;  %2590 = vset.pattern.permute.xlu1 %v2794_v58 }
 0x144   :  { %v755_v10 = vcombine.low %v730_v61, %v738_v62  ;;  %v756_v11 = vcombine.high %v730_v61, %v738_v62  ;;  %v1010_v62 = vld [vmem:[#allocation2 + $0x8] sm:$0xff] }
 0x146   :  { %v763_v15 = vrot.slane %v755_v10, %v3020_v63  ;;  %v770_v17 = vrot.slane %v756_v11, %v3020_v63 }
 0x148   :  { %v771_v19 = vcombine.low %v747_v14, %v763_v15  ;;  %v772_v20 = vcombine.high %v747_v14, %v763_v15  ;;  %v773_v21 = vcombine.low %v754_v16, %v770_v17  ;;  %v774_v22 = vcombine.high %v754_v16, %v770_v17  ;;  %v1012_v16 = vld [vmem:[#allocation2 + $0x18] sm:$0xff] }
 0x14a   :  { %v816_v24 = vpop.f32.mrb[8].mxu0  ;;  %v862_v25 = vpop.f32.mrb[8].mxu1 }
 0x14b   :  { %v817_v26 = vadd.f32 %v816_v24, %v771_v19  ;;  %v863_v28 = vadd.f32 %v862_v25, %v772_v20  ;;  %v2487_v29 = vpop.f32.mrb[9].mxu0  ;;  %v2493_v27 = vpop.f32.mrb[9].mxu1 }
 0x14c   :  { %v819_v31 = vpop.f32.mrb[10].mxu0  ;;  %v865_v33 = vpop.f32.mrb[10].mxu1 }
 0x14d   :  { %v2488_v34 = vpop.f32.mrb[11].mxu0  ;;  %v2494_v35 = vpop.f32.mrb[11].mxu1  ;;  %v3026_v36 = vadd.f32 %v988_v23, %v817_v26  ;;  %v3030_v39 = vadd.f32 %v992_v30, %v863_v28  ;;  %v130_v23 = vld [vmem:[#allocation12 + $0x4] sm:$0xf] }
 0x14e   :  { %v1189_v24 = vsel %vm1141_vm4, %v130_v23, 0 }
 0x14f   :  { %v1013_v38 = vsel %vm143_vm2, %v3026_v36, -inf  ;;  %v1016_v47 = vsel %vm143_vm2, %v3030_v39, -inf  ;;  %2514 = vmatpush3.bf16.msra.mxu1 %v1189_v24 }
 0x150   :  { %1014 = vmax.xlane.f32.xlu0 %v1013_v38  ;;  %2525 = vmatprep.subr.bf16.mxu1 %v2788_v0 }
 0x152   :  { %v908_v42 = vpop.f32.mrb[12].mxu0  ;;  %v954_v43 = vpop.f32.mrb[12].mxu1 }
 0x153   :  { %v909_v44 = vadd.f32 %v908_v42, %v773_v21  ;;  %v955_v45 = vadd.f32 %v954_v43, %v774_v22  ;;  %v2499_v46 = vpop.f32.mrb[13].mxu0  ;;  %v2505_v48 = vpop.f32.mrb[13].mxu1  ;;  %v129_v21 = vld [vmem:[#allocation12] sm:$0xf] }
 0x154   :  { %1017 = vmax.xlane.f32.xlu0 %v1016_v47  ;;  %v911_v50 = vpop.f32.mrb[14].mxu0  ;;  %v957_v51 = vpop.f32.mrb[14].mxu1  ;;  %v1143_v22 = vsel %vm1141_vm4, %v129_v21, 0  ;;  %v132_v47 = vld [vmem:[#allocation12 + $0xc] sm:$0xf] }
 0x155   :  { %v2500_v52 = vpop.f32.mrb[15].mxu0  ;;  %v2506_v53 = vpop.f32.mrb[15].mxu1  ;;  %v1007_v54 = vadd.f32 %v996_v41, %v909_v44  ;;  %v1008_v56 = vadd.f32 %v1000_v49, %v955_v45  ;;  %2508 = vmatpush3.bf16.msra.mxu0 %v1143_v22  ;;  %v1281_v51 = vsel %vm1141_vm4, %v132_v47, 0 }
 0x156   :  { %2519 = vmatprep.subr.bf16.mxu0 %v2788_v0 }
 0x157   :  { %v1019_v55 = vsel %vm143_vm2, %v1007_v54, -inf  ;;  %v1022_v57 = vsel %vm143_vm2, %v1008_v56, -inf }
 0x158   :  { %1020 = vmax.xlane.f32.xlu1 %v1019_v55 }
 0x15c   :  { %1023 = vmax.xlane.f32.xlu1 %v1022_v57 }
 0x1dd   :  { %v1015_v60 = vpop.xlane.xlu0 %1014 }
 0x1de   :  { %v1025_v61 = vmax.f32 %v1009_v59, %v1015_v60 }
 0x1e0   :  { %v1029_v3 = vsub.f32 %v1009_v59, %v1025_v61  ;;  %1074 = vst.msk [vmem:[#allocation2] sm:$0xff] %vm98_vm3, %v1025_v61  ;;  %1043 = vperm.xlu0 %2589, %v1025_v61  }
 0x1e1   :  { %v1018_v10 = vpop.xlane.xlu0 %1017 }
 0x1e2   :  { %v1026_v11 = vmax.f32 %v1010_v62, %v1018_v10  ;;  %v1033_v46 = vmul.f32 1.442695, %v1029_v3 }
 0x1e4   :  { %v1030_v13 = vsub.f32 %v1010_v62, %v1026_v11  ;;  %1075 = vst.msk [vmem:[#allocation2 + $0x8] sm:$0xff] %vm98_vm3, %v1026_v11  ;;  %1048 = vperm.xlu1 %2590, %v1026_v11  }
 0x1e5   :  { %v1021_v14 = vpop.xlane.xlu1 %1020 }
 0x1e6   :  { %v1027_v15 = vmax.f32 %v1011_v12, %v1021_v14  ;;  %v1035_v41 = vmul.f32 1.442695, %v1030_v13 }
 0x1e8   :  { %v1031_v17 = vsub.f32 %v1011_v12, %v1027_v15  ;;  %1076 = vst.msk [vmem:[#allocation2 + $0x10] sm:$0xff] %vm98_vm3, %v1027_v15  ;;  %1053 = vperm.xlu1 %2590, %v1027_v15  }
 0x1e9   :  { %v1024_v18 = vpop.xlane.xlu1 %1023 }
 0x1ea   :  { %v1028_v19 = vmax.f32 %v1012_v16, %v1024_v18  ;;  %v1037_v43 = vmul.f32 1.442695, %v1031_v17 }
 0x1ec   :  { %v1032_v20 = vsub.f32 %v1012_v16, %v1028_v19  ;;  %1077 = vst.msk [vmem:[#allocation2 + $0x18] sm:$0xff] %vm98_vm3, %v1028_v19  ;;  %1058 = vperm.xlu1 %2590, %v1028_v19  }
 0x1ee   :  { %v1039_v35 = vmul.f32 1.442695, %v1032_v20 }
 0x25f   :  { %v1044_v25 = vpop.permute.xlu0 %1043 }
 0x260   :  { %v1061_v26 = vsub.f32 %v3026_v36, %v1044_v25 }
 0x262   :  { %v1065_v28 = vmul.f32 1.442695, %v1061_v26 }
 0x263   :  { %v1049_v29 = vpop.permute.xlu1 %1048 }
 0x264   :  { %2591 = vpow2.f32 %v1065_v28  ;;  %v1062_v27 = vsub.f32 %v3030_v39, %v1049_v29  ;;  %v1235_v39 = vsel %vm1141_vm4, %v131_v40, 0 }
 0x266   :  { %v1067_v30 = vmul.f32 1.442695, %v1062_v27 }
 0x267   :  { %v1054_v31 = vpop.permute.xlu1 %1053 }
 0x268   :  { %2593 = vpow2.f32 %v1067_v30  ;;  %v1063_v33 = vsub.f32 %v1007_v54, %v1054_v31 }
 0x26a   :  { %v1069_v34 = vmul.f32 1.442695, %v1063_v33 }
 0x26b   :  { %v1059_v37 = vpop.permute.xlu1 %1058 }
 0x26c   :  { %2595 = vpow2.f32 %v1069_v34  ;;  %v1064_v38 = vsub.f32 %v1008_v56, %v1059_v37 }
 0x26d   :  { %2597 = vpow2.f32 %v1039_v35 }
 0x26e   :  { %v2592_v42 = vpop.eup %2591  ;;  %v1071_v44 = vmul.f32 1.442695, %v1064_v38 }
 0x26f   :  { %v1086_v36 = vsel %vm143_vm2, %v2592_v42, 0.0  ;;  %v1134_v45 = vpack.c.bf16 %v2592_v42, %v2592_v42 }
 0x270   :  { %2599 = vpow2.f32 %v1071_v44  ;;  %1087 = vadd.xlane.f32.xlu1 %v1086_v36 }
 0x271   :  { %2601 = vpow2.f32 %v1035_v41  ;;  %2510 = vmatmul.mubr.msk.bf16.vlgmr.msra.gmra.mrb[16].mxu0 %vm143_vm2, %v1134_v45  ;;  %v1079_v45 = vld [vmem:[#allocation3 + $0x8] sm:$0xff] }
 0x272   :  { %v2594_v48 = vpop.eup %2593  ;;  %2603 = vpow2.f32 %v1037_v43  ;;  %2520 = vmatpush3.bf16.msra.mxu0 %v1235_v39  ;;  %2521 = vmatprep.mubr.msk.bf16.mxu0 %vm2789_vm1, %v2788_v0  ;;  %v1078_v43 = vld [vmem:[#allocation3] sm:$0xff] }
 0x273   :  { %v1089_v49 = vsel %vm143_vm2, %v2594_v48, 0.0  ;;  %v1135_v50 = vpack.c.bf16 %v2594_v48, %v2594_v48  ;;  %2531 = vmatprep.subr.mxu0 %v2788_v0  ;;  %2605 = vpow2.f32 %v1033_v46 }
 0x274   :  { %1090 = vadd.xlane.f32.xlu0 %v1089_v49 }
 0x275   :  { %2516 = vmatmul.mubr.msk.bf16.vlgmr.msra.gmra.mrb[16].mxu1 %vm143_vm2, %v1135_v50 }
 0x276   :  { %v2596_v52 = vpop.eup %2595  ;;  %2526 = vmatpush3.bf16.msra.mxu1 %v1281_v51  ;;  %2527 = vmatprep.mubr.msk.bf16.mxu1 %vm2789_vm1, %v2788_v0 }
 0x277   :  { %v1092_v53 = vsel %vm143_vm2, %v2596_v52, 0.0  ;;  %v1136_v54 = vpack.c.bf16 %v2596_v52, %v2596_v52  ;;  %2536 = vmatprep.subr.mxu1 %v2788_v0  ;;  %v3059_v55 = vpop.eup %2597  ;;  %v1331_v56 = vcombine.low %v2592_v42, %v2596_v52  ;;  %v1332_v12 = vcombine.high %v2592_v42, %v2596_v52  ;;  %v1081_v52 = vld [vmem:[#allocation3 + $0x18] sm:$0xff] }
 0x278   :  { %1093 = vadd.xlane.f32.xlu1 %v1092_v53 }
 0x279   :  { %2522 = vmatmul.mubr.msk.bf16.vlgmr.msra.gmra.mrb[20].mxu0 %vm143_vm2, %v1136_v54  ;;  %v1339_v10 = vrot.slane %v1331_v56, %v3011_v32  ;;  %v1346_v19 = vrot.slane %v1332_v12, %v3011_v32  ;;  %v1085_v56 = vmul.f32 %v3059_v55, %v1081_v52 }
 0x27a   :  { %v2600_v57 = vpop.eup %2599  ;;  %2533 = vmatprep.mubr.msk.f32.mxu0 %vm2789_vm1, %v2788_v0 }
 0x27b   :  { %v3064_v58 = vpop.eup %2601  ;;  %v1095_v59 = vsel %vm143_vm2, %v2600_v57, 0.0  ;;  %v1137_v60 = vpack.c.bf16 %v2600_v57, %v2600_v57  ;;  %2532 = vmatpush3.xpose.msk.msra.mxu0 %vm143_vm2, %v2923_v1  ;;  %v1347_v61 = vcombine.low %v2594_v48, %v2600_v57  ;;  %v1348_v62 = vcombine.high %v2594_v48, %v2600_v57  ;;  %v1080_v48 = vld [vmem:[#allocation3 + $0x10] sm:$0xff] }
 0x27c   :  { %v3069_v3 = vpop.eup %2603  ;;  %1096 = vadd.xlane.f32.xlu1 %v1095_v59  ;;  %2541 = vmatprep.subr.mxu0 %v2788_v0  ;;  %v1415_v13 = vcombine.low %v3064_v58, %v3059_v55  ;;  %v1416_v25 = vcombine.high %v3064_v58, %v3059_v55  ;;  %v1083_v46 = vmul.f32 %v3064_v58, %v1079_v45 }
 0x27d   :  { %2528 = vmatmul.mubr.msk.bf16.vlgmr.msra.gmra.mrb[20].mxu1 %vm143_vm2, %v1137_v60  ;;  %v1355_v11 = vrot.slane %v1347_v61, %v3011_v32  ;;  %v3077_v14 = vpop.eup %2605  ;;  %v1362_v16 = vrot.slane %v1348_v62, %v3011_v32  ;;  %v1084_v50 = vmul.f32 %v3069_v3, %v1080_v48 }
 0x27e   :  { %2538 = vmatprep.mubr.msk.f32.mxu1 %vm2789_vm1, %v2788_v0  ;;  %v1399_v17 = vcombine.low %v3077_v14, %v3069_v3  ;;  %v1423_v20 = vrot.slane %v1415_v13, %v3011_v32  ;;  %v1430_v30 = vrot.slane %v1416_v25, %v3011_v32  ;;  %v1082_v44 = vmul.f32 %v3077_v14, %v1078_v43  ;;  %v1109_v43 = vld [vmem:[#allocation5 + $0x18] sm:$0xff] }
 0x27f   :  { %2537 = vmatpush3.xpose.msk.msra.mxu1 %vm143_vm2, %v2925_v2  ;;  %v1363_v1 = vcombine.low %v1339_v10, %v1355_v11  ;;  %v1364_v15 = vcombine.high %v1339_v10, %v1355_v11  ;;  %v1379_v22 = vcombine.low %v1346_v19, %v1362_v16  ;;  %v1380_v29 = vcombine.high %v1346_v19, %v1362_v16 }
 0x280   :  { %2546 = vmatprep.subr.mxu1 %v2788_v0  ;;  %v1407_v23 = vrot.slane %v1399_v17, %v3011_v32 }
 0x281   :  { %v1371_v18 = vrot.slane %v1363_v1, %v3020_v63  ;;  %v1378_v2 = vrot.slane %v1364_v15, %v3020_v63  ;;  %v1387_v28 = vrot.slane %v1379_v22, %v3020_v63  ;;  %v1394_v31 = vrot.slane %v1380_v29, %v3020_v63  ;;  %v1106_v29 = vld [vmem:[#allocation5] sm:$0xff] }
 0x282   :  { %v1431_v24 = vcombine.low %v1407_v23, %v1423_v20  ;;  %v1432_v27 = vcombine.high %v1407_v23, %v1423_v20 }
 0x283   :  { %2534 = vmatmul.mubr.msk.f32.vlgmr.msra.gmra.mrb[24].mxu0 %vm143_vm2, %v1371_v18  ;;  %v1395_v21 = vcombine.high %v1371_v18, %v2788_v0  ;;  %v1396_v26 = vcombine.high %v1378_v2, %v2788_v0 }
 0x284   :  { %2542 = vmatpush3.xpose.msk.msra.mxu0 %vm143_vm2, %v2929_v4  ;;  %2543 = vmatprep.mubr.msk.f32.mxu0 %vm2789_vm1, %v2788_v0  ;;  %v1400_v4 = vcombine.high %v3077_v14, %v3069_v3  ;;  %v1446_v34 = vrot.slane %v1432_v27, %v3020_v63 }
 0x285   :  { %2539 = vmatmul.mubr.msk.f32.vlgmr.msra.gmra.mrb[24].mxu1 %vm143_vm2, %v1395_v21  ;;  %2551 = vmatprep.subr.mxu0 %v2788_v0 }
 0x286   :  { %2547 = vmatpush3.xpose.msk.msra.mxu1 %vm143_vm2, %v2931_v5  ;;  %2548 = vmatprep.mubr.msk.f32.mxu1 %vm2789_vm1, %v2788_v0  ;;  %v1439_v5 = vrot.slane %v1431_v24, %v3020_v63  ;;  %v1414_v33 = vrot.slane %v1400_v4, %v3011_v32  ;;  %v1464_v37 = vcombine.high %v1446_v34, %v2788_v0 }
 0x287   :  { %2544 = vmatmul.mubr.msk.f32.vlgmr.msra.gmra.mrb[26].mxu0 %vm143_vm2, %v1378_v2  ;;  %2556 = vmatprep.subr.mxu1 %v2788_v0 }
 0x288   :  { %2552 = vmatpush3.xpose.msk.msra.mxu0 %vm143_vm2, %v2943_v6  ;;  %2553 = vmatprep.mubr.msk.f32.mxu0 %vm2789_vm1, %v2788_v0  ;;  %v1397_v6 = vcombine.high %v1387_v28, %v2788_v0  ;;  %v1447_v35 = vcombine.low %v1414_v33, %v1430_v30  ;;  %v1448_v40 = vcombine.high %v1414_v33, %v1430_v30  ;;  %v1107_v30 = vld [vmem:[#allocation5 + $0x8] sm:$0xff] }
 0x289   :  { %2549 = vmatmul.mubr.msk.f32.vlgmr.msra.gmra.mrb[26].mxu1 %vm143_vm2, %v1396_v26  ;;  %2561 = vmatprep.subr.mxu0 %v2788_v0 }
 0x28a   :  { %1117 = vperm.xlu0 %2589, %v3064_v58   ;;  %2557 = vmatpush3.xpose.msk.msra.mxu1 %vm143_vm2, %v2945_v7  ;;  %v1463_v7 = vcombine.high %v1439_v5, %v2788_v0  ;;  %v1455_v38 = vrot.slane %v1447_v35, %v3020_v63  ;;  %v1462_v41 = vrot.slane %v1448_v40, %v3020_v63 }
 0x28b   :  { %2554 = vmatmul.mubr.msk.f32.vlgmr.msra.gmra.mrb[28].mxu0 %vm143_vm2, %v1387_v28  ;;  %2558 = vmatprep.mubr.msk.f32.mxu1 %vm2789_vm1, %v2788_v0 }
 0x28c   :  { %2562 = vmatpush3.xpose.msk.msra.mxu0 %vm143_vm2, %v2957_v8  ;;  %2566 = vmatprep.subr.mxu1 %v2788_v0  ;;  %v1398_v8 = vcombine.high %v1394_v31, %v2788_v0  ;;  %v1466_v42 = vcombine.high %v1462_v41, %v2788_v0 }
 0x28d   :  { %2559 = vmatmul.mubr.msk.f32.vlgmr.msra.gmra.mrb[28].mxu1 %vm143_vm2, %v1397_v6  ;;  %1112 = vperm.xlu1 %2590, %v3077_v14  }
 0x28e   :  { %2563 = vmatprep.mubr.msk.f32.mxu0 %vm2789_vm1, %v2788_v0  ;;  %2567 = vmatpush3.xpose.msk.msra.mxu1 %vm143_vm2, %v2959_v9  ;;  %v1465_v9 = vcombine.high %v1455_v38, %v2788_v0 }
 0x28f   :  { %1482 = vperm.xlu0 %2589, %v1463_v7   ;;  %2564 = vmatmul.mubr.msk.f32.vlgmr.msra.gmra.mrb[30].mxu0 %vm143_vm2, %v1394_v31 }
 0x290   :  { %2568 = vmatprep.mubr.msk.f32.mxu1 %vm2789_vm1, %v2788_v0 }
 0x291   :  { %2569 = vmatmul.mubr.msk.f32.vlgmr.msra.gmra.mrb[30].mxu1 %vm143_vm2, %v1398_v8  ;;  %1122 = vperm.xlu1 %2590, %v3069_v3  }
 0x293   :  { %1492 = vperm.xlu0 %2589, %v1464_v37   ;;  %v1108_v37 = vld [vmem:[#allocation5 + $0x10] sm:$0xff] }
 0x295   :  { %1127 = vperm.xlu1 %2590, %v3059_v55  }
 0x297   :  { %1502 = vperm.xlu0 %2589, %v1465_v9  }
 0x299   :  { %1477 = vperm.xlu1 %2590, %v1439_v5  }
 0x29b   :  { %1512 = vperm.xlu0 %2589, %v1466_v42  }
 0x29d   :  { %1487 = vperm.xlu1 %2590, %v1446_v34  }
 0x2a1   :  { %1497 = vperm.xlu1 %2590, %v1455_v38  }
 0x2a5   :  { %1507 = vperm.xlu1 %2590, %v1462_v41  }
 0x2fd   :  { %v1088_v36 = vpop.xlane.xlu1 %1087 }
 0x2fe   :  { %v1098_v39 = vadd.f32 %v1088_v36, %v1082_v44 }
 0x300   :  { %1102 = vst.msk [vmem:[#allocation3] sm:$0xff] %vm98_vm3, %v1098_v39 }
 0x301   :  { %v1091_v47 = vpop.xlane.xlu0 %1090 }
 0x302   :  { %v1099_v49 = vadd.f32 %v1091_v47, %v1083_v46 }
 0x304   :  { %1103 = vst.msk [vmem:[#allocation3 + $0x8] sm:$0xff] %vm98_vm3, %v1099_v49 }
 0x305   :  { %v1094_v51 = vpop.xlane.xlu1 %1093 }
 0x306   :  { %v1100_v53 = vadd.f32 %v1094_v51, %v1084_v50 }
 0x307   :  { %v2151_v54 = vld [vmem:[#allocation3] sm:$0xff] }
 0x308   :  { %1104 = vst.msk [vmem:[#allocation3 + $0x10] sm:$0xff] %vm98_vm3, %v1100_v53  ;;  %2607 = vrcp.f32 %v2151_v54  ;;  %v1467_v53 = vld [vmem:[#allocation4] sm:$0xf] }
 0x309   :  { %v1097_v57 = vpop.xlane.xlu1 %1096  ;;  %v1118_v6 = vpop.permute.xlu0 %1117 }
 0x30a   :  { %v1101_v59 = vadd.f32 %v1097_v57, %v1085_v56  ;;  %v1131_v8 = vmul.f32 %v1118_v6, %v1107_v30 }
 0x30b   :  { %v2152_v60 = vld [vmem:[#allocation3 + $0x8] sm:$0xff] }
 0x30c   :  { %1105 = vst.msk [vmem:[#allocation3 + $0x18] sm:$0xff] %vm98_vm3, %v1101_v59  ;;  %2609 = vrcp.f32 %v2152_v60  ;;  %v1468_v59 = vld [vmem:[#allocation4 + $0x4] sm:$0xf] }
 0x30d   :  { %v1113_v28 = vpop.permute.xlu1 %1112 }
 0x30e   :  { %v1130_v27 = vmul.f32 %v1113_v28, %v1106_v29  ;;  %v1483_v46 = vpop.permute.xlu0 %1482 }
 0x30f   :  { %v2153_v58 = vld [vmem:[#allocation3 + $0x10] sm:$0xff] }
 0x310   :  { %2611 = vrcp.f32 %v2153_v58 }
 0x311   :  { %v1123_v5 = vpop.permute.xlu1 %1122 }
 0x312   :  { %v2608_v61 = vpop.eup %2607  ;;  %v1132_v41 = vmul.f32 %v1123_v5, %v1108_v37  ;;  %v1493_v60 = vpop.permute.xlu0 %1492 }
 0x313   :  { %2169 = vperm.xlu1 %2590, %v2608_v61   ;;  %v2154_v62 = vld [vmem:[#allocation3 + $0x18] sm:$0xff] }
 0x314   :  { %2613 = vrcp.f32 %v2154_v62 }
 0x315   :  { %v1128_v34 = vpop.permute.xlu1 %1127 }
 0x316   :  { %v2610_v3 = vpop.eup %2609  ;;  %v1133_v48 = vmul.f32 %v1128_v34, %v1109_v43 }
 0x317   :  { %2174 = vperm.xlu0 %2589, %v2610_v3  }
 0x319   :  { %v1478_v44 = vpop.permute.xlu1 %1477 }
 0x31a   :  { %v2612_v10 = vpop.eup %2611  ;;  %v1515_v58 = vmul.f32 %v1478_v44, %v1467_v53 }
 0x31b   :  { %2179 = vperm.xlu1 %2590, %v2612_v10   ;;  %v2195_v11 = vcombine.low %v2608_v61, %v2612_v10  ;;  %v2196_v15 = vcombine.high %v2608_v61, %v2612_v10  ;;  %v1469_v61 = vld [vmem:[#allocation4 + $0x8] sm:$0xf] }
 0x31d   :  { %v2203_v14 = vrot.slane %v2195_v11, %v3011_v32  ;;  %v2210_v20 = vrot.slane %v2196_v15, %v3011_v32  ;;  %v1488_v54 = vpop.permute.xlu1 %1487 }
 0x31e   :  { %v2614_v12 = vpop.eup %2613 }
 0x31f   :  { %2184 = vperm.xlu0 %2589, %v2614_v12   ;;  %v2211_v55 = vcombine.low %v2610_v3, %v2614_v12  ;;  %v2212_v13 = vcombine.high %v2610_v3, %v2614_v12  ;;  %v1516_v3 = vmul.f32 %v1483_v46, %v1468_v59  ;;  %v1470_v12 = vld [vmem:[#allocation4 + $0xc] sm:$0xf] }
 0x321   :  { %v2219_v1 = vrot.slane %v2211_v55, %v3011_v32  ;;  %v2226_v18 = vrot.slane %v2212_v13, %v3011_v32  ;;  %v1498_v55 = vpop.permute.xlu1 %1497 }
 0x323   :  { %v2227_v16 = vcombine.low %v2203_v14, %v2219_v1  ;;  %v2228_v17 = vcombine.high %v2203_v14, %v2219_v1  ;;  %v2243_v22 = vcombine.low %v2210_v20, %v2226_v18  ;;  %v2244_v25 = vcombine.high %v2210_v20, %v2226_v18 }
 0x324   :  { %v1517_v14 = vmul.f32 %v1488_v54, %v1469_v61 }
 0x325   :  { %v2235_v19 = vrot.slane %v2227_v16, %v3020_v63  ;;  %v2242_v2 = vrot.slane %v2228_v17, %v3020_v63  ;;  %v2251_v24 = vrot.slane %v2243_v22, %v3020_v63  ;;  %v2258_v26 = vrot.slane %v2244_v25, %v3020_v63  ;;  %v1503_v16 = vpop.permute.xlu0 %1502  ;;  %v1471_v17 = vld [vmem:[#allocation4 + $0x10] sm:$0xf] }
 0x327   :  { %2273 = vperm.xlu1 %2590, %v2235_v19   ;;  %v2259_v21 = vcombine.high %v2235_v19, %v2788_v0  ;;  %v2260_v23 = vcombine.high %v2242_v2, %v2788_v0  ;;  %v2261_v4 = vcombine.high %v2251_v24, %v2788_v0  ;;  %v2262_v32 = vcombine.high %v2258_v26, %v2788_v0 }
 0x328   :  { %v1518_v19 = vmul.f32 %v1493_v60, %v1470_v12 }
 0x329   :  { %2278 = vperm.xlu0 %2589, %v2259_v21   ;;  %v1513_v30 = vpop.permute.xlu0 %1512 }
 0x32b   :  { %2283 = vperm.xlu1 %2590, %v2242_v2   ;;  %v1472_v2 = vld [vmem:[#allocation4 + $0x14] sm:$0xf] }
 0x32c   :  { %v1520_v28 = vmul.f32 %v1503_v16, %v1472_v2 }
 0x32d   :  { %2288 = vperm.xlu0 %2589, %v2260_v23   ;;  %v1519_v23 = vmul.f32 %v1498_v55, %v1471_v17 }
 0x32f   :  { %2293 = vperm.xlu1 %2590, %v2251_v24  }
 0x331   :  { %2298 = vperm.xlu0 %2589, %v2261_v4   ;;  %v1473_v4 = vld [vmem:[#allocation4 + $0x18] sm:$0xf] }
 0x333   :  { %2303 = vperm.xlu1 %2590, %v2258_v26   ;;  %v1508_v26 = vpop.permute.xlu1 %1507 }
 0x335   :  { %2308 = vperm.xlu0 %2589, %v2262_v32  }
 0x344   :  { %v1179_v31 = vpop.f32.mrb[16].mxu0 }
 0x345   :  { %v1323_v33 = vadd.f32 %v1179_v31, %v1130_v27  ;;  %v2511_v7 = vpop.f32.mrb[17].mxu0  ;;  %v1474_v27 = vld [vmem:[#allocation4 + $0x1c] sm:$0xf]  ;;  %v1521_v31 = vmul.f32 %v1508_v26, %v1473_v4 }
 0x346   :  { %v1182_v35 = vpop.f32.mrb[18].mxu0 }
 0x347   :  { %1327 = vst.msk [vmem:[#allocation5] sm:$0xff] %vm116_vm0, %v1323_v33  ;;  %v2512_v63 = vpop.f32.mrb[19].mxu0  ;;  %v1522_v35 = vmul.f32 %v1513_v30, %v1474_v27 }
 0x348   :  { %v1225_v38 = vpop.f32.mrb[16].mxu1 }
 0x349   :  { %v1324_v40 = vadd.f32 %v1225_v38, %v1131_v8  ;;  %v2517_v0 = vpop.f32.mrb[17].mxu1 }
 0x34a   :  { %v1228_v9 = vpop.f32.mrb[18].mxu1 }
 0x34b   :  { %1328 = vst.msk [vmem:[#allocation5 + $0x8] sm:$0xff] %vm116_vm0, %v1324_v40  ;;  %v2518_v42 = vpop.f32.mrb[19].mxu1 }
 0x34c   :  { %v1271_v36 = vpop.f32.mrb[20].mxu0 }
 0x34d   :  { %v1325_v45 = vadd.f32 %v1271_v36, %v1132_v41  ;;  %v2523_v39 = vpop.f32.mrb[21].mxu0 }
 0x34e   :  { %v1274_v47 = vpop.f32.mrb[22].mxu0  ;;  %v2163_v0 = vld [vmem:[#allocation5] sm:$0xff] }
 0x34f   :  { %1329 = vst.msk [vmem:[#allocation5 + $0x10] sm:$0xff] %vm116_vm0, %v1325_v45  ;;  %v2524_v49 = vpop.f32.mrb[23].mxu0 }
 0x350   :  { %v1317_v50 = vpop.f32.mrb[20].mxu1 }
 0x351   :  { %v1326_v51 = vadd.f32 %v1317_v50, %v1133_v48  ;;  %v2529_v52 = vpop.f32.mrb[21].mxu1 }
 0x352   :  { %v1320_v56 = vpop.f32.mrb[22].mxu1  ;;  %v2164_v42 = vld [vmem:[#allocation5 + $0x8] sm:$0xff] }
 0x353   :  { %1330 = vst.msk [vmem:[#allocation5 + $0x18] sm:$0xff] %vm116_vm0, %v1326_v51  ;;  %v2530_v57 = vpop.f32.mrb[23].mxu1 }
 0x356   :  { %v1595_v62 = vpop.f32.mrb[24].mxu0  ;;  %v2165_v36 = vld [vmem:[#allocation5 + $0x10] sm:$0xff] }
 0x357   :  { %v2131_v10 = vadd.f32 %v1595_v62, %v1515_v58  ;;  %v2535_v11 = vpop.f32.mrb[25].mxu0 }
 0x358   :  { %v1671_v13 = vpop.f32.mrb[24].mxu1 }
 0x359   :  { %2140 = vst.msk [vmem:[#allocation4] sm:$0xf] %vm107_vm5, %v2131_v10  ;;  %v2132_v1 = vadd.f32 %v1671_v13, %v1516_v3  ;;  %v2540_v15 = vpop.f32.mrb[25].mxu1 }
 0x35a   :  { %v1747_v18 = vpop.f32.mrb[26].mxu0  ;;  %v2166_v46 = vld [vmem:[#allocation5 + $0x18] sm:$0xff] }
 0x35b   :  { %2141 = vst.msk [vmem:[#allocation4 + $0x4] sm:$0xf] %vm107_vm5, %v2132_v1  ;;  %v2133_v20 = vadd.f32 %v1747_v18, %v1517_v14  ;;  %v2545_v21 = vpop.f32.mrb[27].mxu0 }
 0x35c   :  { %v1823_v22 = vpop.f32.mrb[26].mxu1 }
 0x35d   :  { %2142 = vst.msk [vmem:[#allocation4 + $0x8] sm:$0xf] %vm107_vm5, %v2133_v20  ;;  %v2134_v24 = vadd.f32 %v1823_v22, %v1518_v19  ;;  %v2550_v25 = vpop.f32.mrb[27].mxu1 }
 0x35e   :  { %v1899_v32 = vpop.f32.mrb[28].mxu0 }
 0x35f   :  { %2143 = vst.msk [vmem:[#allocation4 + $0xc] sm:$0xf] %vm107_vm5, %v2134_v24  ;;  %v2135_v29 = vadd.f32 %v1899_v32, %v1519_v23  ;;  %v2555_v5 = vpop.f32.mrb[29].mxu0 }
 0x360   :  { %v1975_v6 = vpop.f32.mrb[28].mxu1 }
 0x361   :  { %2144 = vst.msk [vmem:[#allocation4 + $0x10] sm:$0xf] %vm107_vm5, %v2135_v29  ;;  %v2136_v33 = vadd.f32 %v1975_v6, %v1520_v28  ;;  %v2560_v7 = vpop.f32.mrb[29].mxu1 }
 0x362   :  { %v2051_v34 = vpop.f32.mrb[30].mxu0 }
 0x363   :  { %2145 = vst.msk [vmem:[#allocation4 + $0x14] sm:$0xf] %vm107_vm5, %v2136_v33  ;;  %v2137_v8 = vadd.f32 %v2051_v34, %v1521_v31  ;;  %v2565_v63 = vpop.f32.mrb[31].mxu0 }
 0x364   :  { %v2127_v37 = vpop.f32.mrb[30].mxu1 }
 0x365   :  { %2146 = vst.msk [vmem:[#allocation4 + $0x18] sm:$0xf] %vm107_vm5, %v2137_v8  ;;  %v2138_v38 = vadd.f32 %v2127_v37, %v1522_v35  ;;  %v2570_v40 = vpop.f32.mrb[31].mxu1 }
 0x367   :  { %2147 = vst.msk [vmem:[#allocation4 + $0x1c] sm:$0xf] %vm107_vm5, %v2138_v38 }
 0x392   :  { %v2170_v9 = vpop.permute.xlu1 %2169 }
 0x393   :  { %v2187_v41 = vmul.f32 %v2170_v9, %v2163_v0 }
 0x395   :  { %2191 = vst.msk [vmem:[#allocation16] sm:$0xff] %vm116_vm0, %v2187_v41 }
 0x396   :  { %v2175_v43 = vpop.permute.xlu0 %2174 }
 0x397   :  { %v2188_v44 = vmul.f32 %v2175_v43, %v2164_v42 }
 0x399   :  { %2192 = vst.msk [vmem:[#allocation16 + $0x8] sm:$0xff] %vm116_vm0, %v2188_v44 }
 0x39a   :  { %v2180_v45 = vpop.permute.xlu1 %2179 }
 0x39b   :  { %v2189_v39 = vmul.f32 %v2180_v45, %v2165_v36 }
 0x39d   :  { %2193 = vst.msk [vmem:[#allocation16 + $0x10] sm:$0xff] %vm116_vm0, %v2189_v39 }
 0x39e   :  { %v2185_v47 = vpop.permute.xlu0 %2184 }
 0x39f   :  { %v2190_v48 = vmul.f32 %v2185_v47, %v2166_v46 }
 0x3a1   :  { %2194 = vst.msk [vmem:[#allocation16 + $0x18] sm:$0xff] %vm116_vm0, %v2190_v48 }
 0x3a2   :  { %2736 = shalt.err (!%p2733_p2)
}
 0x3a3   :  { %s2737_s23 = scalar_lea.hbm %s3249_s7, 512 }
 0x3a4   :  { %p2738_p3 = scmp.ne.s32.totalorder %s3249_s7, %s2737_s23  ;;  %p2741_p4 = scmp.lt.u32.totalorder %s2737_s23, %s3249_s7 }
 0x3a6   :  { %p2743_p5 = pnand %p2741_p4, %p2738_p3 }
 0x3a8   :  { %2746 = shalt.err (!%p2743_p5)
}
 0x3a9   :  { %2350 = dma.vmem_to_hbm [thread:$0]  %s2345_s19, 512, %s3249_s7, [#allocation17], %s2786_s2, %s2786_s2, %s2787_s4   ;;  %v2263_v49 = vld [vmem:[#allocation4] sm:$0xf]  ;;  %v2274_v50 = vpop.permute.xlu1 %2273  ;;  %v2264_v52 = vld [vmem:[#allocation4 + $0x4] sm:$0xf]  ;;  %v2279_v53 = vpop.permute.xlu0 %2278 }
 0x3aa   :  { %v2311_v51 = vmul.f32 %v2274_v50, %v2263_v49  ;;  %v2312_v54 = vmul.f32 %v2279_v53, %v2264_v52  ;;  %v2265_v56 = vld [vmem:[#allocation4 + $0x8] sm:$0xf]  ;;  %v2266_v60 = vld [vmem:[#allocation4 + $0xc] sm:$0xf]  ;;  %v2267_v62 = vld [vmem:[#allocation4 + $0x10] sm:$0xf] }
 0x3ab   :  { %v2268_v11 = vld [vmem:[#allocation4 + $0x14] sm:$0xf]  ;;  %v2269_v13 = vld [vmem:[#allocation4 + $0x18] sm:$0xf]  ;;  %s2796_s7 = smov [#allocation15]  }
 0x3ac   :  { %2319 = vst.msk [vmem:[#allocation15] sm:$0xf] %vm107_vm5, %v2311_v51  ;;  %2320 = vst.msk [vmem:[#allocation15 + $0x4] sm:$0xf] %vm107_vm5, %v2312_v54  ;;  %s2332_s27 = sshll.u32 %s2796_s7, 4  ;;  %s2333_s27 = int_to_ptr.vmem [resolvable:$true] %s2332_s27 }
 0x3ad   :  { %v2284_v57 = vpop.permute.xlu1 %2283  ;;  %v2289_v58 = vpop.permute.xlu0 %2288  ;;  %v2270_v15 = vld [vmem:[#allocation4 + $0x1c] sm:$0xf]  ;;  %s2747_s28 = scalar_lea.vmem %s2333_s27, 512  ;;  %p2752_p7 = scmp.lt.s32.totalorder %s2333_s27, %s2333_s27 }
 0x3ae   :  { %v2313_v59 = vmul.f32 %v2284_v57, %v2265_v56  ;;  %v2314_v61 = vmul.f32 %v2289_v58, %v2266_v60  ;;  %p2748_p6 = scmp.ne.s32.totalorder %s2333_s27, %s2747_s28  ;;  %p2753_p8 = scmp.lt.s32.totalorder %s2747_s28, %s2747_s28 }
 0x3b0   :  { %2321 = vst.msk [vmem:[#allocation15 + $0x8] sm:$0xf] %vm107_vm5, %v2313_v59  ;;  %2322 = vst.msk [vmem:[#allocation15 + $0xc] sm:$0xf] %vm107_vm5, %v2314_v61  ;;  %p2754_p9 = por %p2753_p8, %p2752_p7 }
 0x3b1   :  { %v2294_v3 = vpop.permute.xlu1 %2293  ;;  %v2299_v12 = vpop.permute.xlu0 %2298 }
 0x3b2   :  { %v2315_v10 = vmul.f32 %v2294_v3, %v2267_v62  ;;  %v2316_v55 = vmul.f32 %v2299_v12, %v2268_v11  ;;  %p2755_p10 = pnand %p2754_p9, %p2748_p6 }
 0x3b4   :  { %2323 = vst.msk [vmem:[#allocation15 + $0x10] sm:$0xf] %vm107_vm5, %v2315_v10  ;;  %2324 = vst.msk [vmem:[#allocation15 + $0x14] sm:$0xf] %vm107_vm5, %v2316_v55 }
 0x3b5   :  { %v2304_v14 = vpop.permute.xlu1 %2303  ;;  %v2309_v16 = vpop.permute.xlu0 %2308 }
 0x3b6   :  { %v2317_v1 = vmul.f32 %v2304_v14, %v2269_v13  ;;  %v2318_v17 = vmul.f32 %v2309_v16, %v2270_v15 }
 0x3b8   :  { %2325 = vst.msk [vmem:[#allocation15 + $0x18] sm:$0xf] %vm107_vm5, %v2317_v1  ;;  %2326 = vst.msk [vmem:[#allocation15 + $0x1c] sm:$0xf] %vm107_vm5, %v2318_v17 }
 0x3b9   :  { %2758 = shalt.err (!%p2755_p10)
}
 0x3ba   :  { %s2759_s8 = scalar_lea.hbm %s3248_s6, 512 }
 0x3bb   :  { %p2760_p11 = scmp.ne.s32.totalorder %s3248_s6, %s2759_s8  ;;  %p2763_p12 = scmp.lt.u32.totalorder %s2759_s8, %s3248_s6 }
 0x3bd   :  { %p2765_p13 = pnand %p2763_p12, %p2760_p11 }
 0x3bf   :  { %2768 = shalt.err (!%p2765_p13)
}
 0x3c0   :  { %2338 = dma.vmem_to_hbm [thread:$0]  %s2333_s27, 512, %s3248_s6, [#allocation8], %s2780_s11, %s2780_s11, %s2781_s12  }
 0x3c1   :  { %2775 = dma.done.wait [#allocation8], 512  }
 0x3c2   :  { %2776 = vsyncadd [#allocation8], 4294966784 }
 0x3c3   :  { %2777 = dma.done.wait [#allocation17], 512  }
 0x3c4   :  { %2778 = vsyncadd [#allocation17], 4294966784 }
 0x3c5   :  { %2357 = vsyncpa [#allocation7], 1 }
 0x3c6   :  { %2358 = vsyncpa [#allocation10], 1 }
 0x3c7   :  { %2359 = vsyncpa [#allocation13], 1 }
 0x3c8   :  { %2360 = vsyncpa [#allocation8], 1 }
 0x3c9   :  { %2361 = vsyncpa [#allocation17], 1 }

</bundles_post_ra>
